<compile_context>
chip_gen: v7x
topology: tpu7x:2x2x1
jax: 0.10.0
libtpu: 0.0.40
codegen_flags: <defaults>
</compile_context>

<pallas_src>
import math
import jax
import jax.numpy as jnp
from jax.experimental import pallas as pl
from jax.experimental.pallas import tpu as pltpu

# ----------------------------- model config ---------------------------------
B = 2          # batch
T = 8          # sequence length
D = 32         # model size (layer.size)
H = 4          # attention heads
DK = D // H    # per-head dim
F = 64         # feed-forward hidden dim
N_LAYERS = 2   # Encoder depth N
EPS = 1e-6
NEG_INF = -1e9

INV_D = 1.0 / D
INV_DM1 = 1.0 / (D - 1)
INV_SQRT_DK = 1.0 / math.sqrt(DK)

LANES = 128          # lane-dense slab width
W_ROWS = 3 * D + F   # 160 rows per layer: [WQ|WK|WV], WO, W1, W2 row blocks
B_ROWS = 8           # bias/LN rows per layer
R = B * T            # batch folded into one grid step -> flattened rows


# ------------------------------ Pallas kernel --------------------------------
def _layer_norm(v, a, b):
    """PyTorch-style LayerNorm: unbiased std, eps added to std (exact recip)."""
    mean = jnp.sum(v, axis=-1, keepdims=True) * jnp.float32(INV_D)
    diff = v - mean
    var = jnp.sum(diff * diff, axis=-1, keepdims=True) * jnp.float32(INV_DM1)
    inv = pl.reciprocal(jnp.sqrt(var) + jnp.float32(EPS), approx=False)
    return a * diff * inv + b


def encoder_kernel(x_ref, mask_ref, w_ref, b_ref, n_ref, o_ref):
    # Activations kept flat (R, D): projections / FFN are plain 2-D matmuls.
    x = x_ref[...].reshape(R, D)                                  # (16, 32) f32

    # Additive mask bias, built and broadcast ONCE (hoisted out of all loops).
    mbias = jnp.broadcast_to(
        jnp.where(mask_ref[...] == 0.0,
                  jnp.float32(NEG_INF), jnp.float32(0.0)),
        (B, T, T))                                                # (2, 8, 8)

    for l in range(N_LAYERS):
        # ---- static slab slices (all at lane offset 0, row offsets %8==0) ----
        wqkv = w_ref[l, 0:D, 0:3 * D]            # (32, 96) bf16 [WQ/sqrt(dk)|WK|WV]
        wo = w_ref[l, D:2 * D, 0:D]              # (32, 32) bf16
        w1 = w_ref[l, 2 * D:3 * D, 0:F]          # (32, 64) bf16
        w2 = w_ref[l, 3 * D:3 * D + F, 0:D]      # (64, 32) bf16
        bqkv = b_ref[l, 0:1, 0:3 * D]            # (1, 96) f32 (bq pre-scaled)
        bo = b_ref[l, 1:2, 0:D]
        b1 = b_ref[l, 2:3, 0:F]
        b2 = b_ref[l, 3:4, 0:D]
        ln1a = b_ref[l, 4:5, 0:D]
        ln1b = b_ref[l, 5:6, 0:D]
        ln2a = b_ref[l, 6:7, 0:D]
        ln2b = b_ref[l, 7:8, 0:D]

        # ---- sublayer 0: x + SelfAttn(LayerNorm(x)) --------------------------
        xn = _layer_norm(x, ln1a, ln1b)
        # One fused QKV matmul per layer (bf16 in, f32 accumulate).
        proj = jnp.dot(xn.astype(jnp.bfloat16), wqkv,
                       preferred_element_type=jnp.float32) + bqkv  # (16, 96) f32

        heads = []
        for h in range(H):
            # Static 8-lane head slices of the fused projection.
            qh = proj[:, h * DK:(h + 1) * DK].reshape(B, T, DK)         # scaled Q
            kh = proj[:, D + h * DK:D + (h + 1) * DK].reshape(B, T, DK)
            vh = proj[:, 2 * D + h * DK:2 * D + (h + 1) * DK].reshape(B, T, DK)
            s = jnp.einsum('bqe,bke->bqk', qh, kh,
                           preferred_element_type=jnp.float32) + mbias  # (2,8,8)
            s = s - jnp.max(s, axis=-1, keepdims=True)
            p = jnp.exp(s)
            p = p * pl.reciprocal(jnp.sum(p, axis=-1, keepdims=True),
                                  approx=True)
            ch = jnp.einsum('bqk,bke->bqe', p, vh,
                            preferred_element_type=jnp.float32)
            heads.append(ch.reshape(R, DK))

        # Lane-concat heads -> one (R, D) context tile -> ONE output projection.
        ctx = jnp.concatenate(heads, axis=-1)                      # (16, 32)
        attn = jnp.dot(ctx.astype(jnp.bfloat16), wo,
                       preferred_element_type=jnp.float32) + bo
        x = x + attn

        # ---- sublayer 1: x + FFN(LayerNorm(x)) -------------------------------
        xn = _layer_norm(x, ln2a, ln2b)
        hmid = jnp.maximum(
            jnp.dot(xn.astype(jnp.bfloat16), w1,
                    preferred_element_type=jnp.float32) + b1, 0.0)
        x = x + jnp.dot(hmid.astype(jnp.bfloat16), w2,
                        preferred_element_type=jnp.float32) + b2

    # ---- final Encoder.norm ---------------------------------------------------
    x = _layer_norm(x, n_ref[0:1, 0:D], n_ref[1:2, 0:D])

    # Lane-dense output (B, T*D) = (2, 256): lane-concatenate the T time steps
    # of each batch row (reshaped back to (B, T, D) outside the kernel).
    x3 = x.reshape(B, T, D)
    o_ref[...] = jnp.concatenate([x3[:, t, :] for t in range(T)], axis=-1)


# ------------------------------ wrapper --------------------------------------
def _pack_params(params):
    """Pack all weights/biases into lane-dense slabs (last dim 128)."""
    wq = params["wq"] * jnp.float32(INV_SQRT_DK)   # fold 1/sqrt(dk) into Q
    bq = params["bq"] * jnp.float32(INV_SQRT_DK)
    wqkv = jnp.concatenate([wq, params["wk"], params["wv"]], axis=-1)  # (L,D,3D)
    bqkv = jnp.concatenate([bq, params["bk"], params["bv"]], axis=-1)  # (L,1,3D)

    w = jnp.zeros((N_LAYERS, W_ROWS, LANES), jnp.float32)
    w = w.at[:, 0:D, 0:3 * D].set(wqkv)
    w = w.at[:, D:2 * D, 0:D].set(params["wo"])
    w = w.at[:, 2 * D:3 * D, 0:F].set(params["w1"])
    w = w.at[:, 3 * D:3 * D + F, 0:D].set(params["w2"])
    w = w.astype(jnp.bfloat16)                     # bf16 MXU inputs

    bl = jnp.zeros((N_LAYERS, B_ROWS, LANES), jnp.float32)
    bl = bl.at[:, 0:1, 0:3 * D].set(bqkv)
    bl = bl.at[:, 1:2, 0:D].set(params["bo"])
    bl = bl.at[:, 2:3, 0:F].set(params["b1"])
    bl = bl.at[:, 3:4, 0:D].set(params["b2"])
    bl = bl.at[:, 4:5, 0:D].set(params["ln1a"])
    bl = bl.at[:, 5:6, 0:D].set(params["ln1b"])
    bl = bl.at[:, 6:7, 0:D].set(params["ln2a"])
    bl = bl.at[:, 7:8, 0:D].set(params["ln2b"])

    n = jnp.zeros((2, LANES), jnp.float32)
    n = n.at[0:1, 0:D].set(params["na"])
    n = n.at[1:2, 0:D].set(params["nb"])
    return w, bl, n


def encoder_forward(x, mask, params):
    wslab, bslab, nslab = _pack_params(params)

    out = pl.pallas_call(
        encoder_kernel,
        out_shape=jax.ShapeDtypeStruct((B, T * D), jnp.float32),
        grid_spec=pltpu.PrefetchScalarGridSpec(
            num_scalar_prefetch=0,
            grid=(1,),   # batch folded everywhere (review: drop per-core split)
            in_specs=[
                pl.BlockSpec((B, T, D), lambda i: (0, 0, 0)),              # x
                pl.BlockSpec((B, 1, T), lambda i: (0, 0, 0)),              # mask
                pl.BlockSpec((N_LAYERS, W_ROWS, LANES), lambda i: (0, 0, 0)),
                pl.BlockSpec((N_LAYERS, B_ROWS, LANES), lambda i: (0, 0, 0)),
                pl.BlockSpec((2, LANES), lambda i: (0, 0)),                # final norm
            ],
            out_specs=pl.BlockSpec((B, T * D), lambda i: (0, 0)),
        ),
        compiler_params=pltpu.CompilerParams(
            dimension_semantics=("arbitrary",)),
    )(x, mask, wslab, bslab, nslab)

    return out.reshape(B, T, D)


# ------------------------------ pure-JAX reference ----------------------------
def _layer_norm_ref(v, a, b):
    mean = jnp.mean(v, axis=-1, keepdims=True)
    var = jnp.sum((v - mean) ** 2, axis=-1, keepdims=True) / (v.shape[-1] - 1)
    std = jnp.sqrt(var)
    return a * (v - mean) / (std + EPS) + b


def encoder_reference(x, mask, params):
    hp = jax.lax.Precision.HIGHEST
    out = []
    for b in range(B):
        xb = x[b].astype(jnp.float32)
        mb = mask[b]                                    # (1, T)
        for l in range(N_LAYERS):
            xn = _layer_norm_ref(xb, params["ln1a"][l], params["ln1b"][l])
            q = xn @ params["wq"][l] + params["bq"][l]
            k = xn @ params["wk"][l] + params["bk"][l]
            v = xn @ params["wv"][l] + params["bv"][l]
            heads = []
            for h in range(H):
                sl = slice(h * DK, (h + 1) * DK)
                s = jnp.dot(q[:, sl], k[:, sl].T, precision=hp) / math.sqrt(DK)
                s = jnp.where(mb == 0, NEG_INF, s)
                p = jax.nn.softmax(s, axis=-1)
                heads.append(jnp.dot(p, v[:, sl], precision=hp))
            ctx = jnp.concatenate(heads, axis=-1)
            xb = xb + ctx @ params["wo"][l] + params["bo"][l]
            xn = _layer_norm_ref(xb, params["ln2a"][l], params["ln2b"][l])
            hmid = jnp.maximum(xn @ params["w1"][l] + params["b1"][l], 0.0)
            xb = xb + hmid @ params["w2"][l] + params["b2"][l]
        xb = _layer_norm_ref(xb, params["na"], params["nb"])
        out.append(xb)
    return jnp.stack(out, axis=0)


# ------------------------------ param init ------------------------------------
def init_params(key):
    ks = jax.random.split(key, 16)
    s = 0.1
    p = {
        "wq": jax.random.normal(ks[0], (N_LAYERS, D, D), jnp.float32) * s,
        "bq": jax.random.normal(ks[1], (N_LAYERS, 1, D), jnp.float32) * s,
        "wk": jax.random.normal(ks[2], (N_LAYERS, D, D), jnp.float32) * s,
        "bk": jax.random.normal(ks[3], (N_LAYERS, 1, D), jnp.float32) * s,
        "wv": jax.random.normal(ks[4], (N_LAYERS, D, D), jnp.float32) * s,
        "bv": jax.random.normal(ks[5], (N_LAYERS, 1, D), jnp.float32) * s,
        "wo": jax.random.normal(ks[6], (N_LAYERS, D, D), jnp.float32) * s,
        "bo": jax.random.normal(ks[7], (N_LAYERS, 1, D), jnp.float32) * s,
        "w1": jax.random.normal(ks[8], (N_LAYERS, D, F), jnp.float32) * s,
        "b1": jax.random.normal(ks[9], (N_LAYERS, 1, F), jnp.float32) * s,
        "w2": jax.random.normal(ks[10], (N_LAYERS, F, D), jnp.float32) * s,
        "b2": jax.random.normal(ks[11], (N_LAYERS, 1, D), jnp.float32) * s,
        # LayerNorm params: a_2 = ones, b_2 = zeros (matches module __init__)
        "ln1a": jnp.ones((N_LAYERS, 1, D), jnp.float32),
        "ln1b": jnp.zeros((N_LAYERS, 1, D), jnp.float32),
        "ln2a": jnp.ones((N_LAYERS, 1, D), jnp.float32),
        "ln2b": jnp.zeros((N_LAYERS, 1, D), jnp.float32),
        "na": jnp.ones((1, D), jnp.float32),
        "nb": jnp.zeros((1, D), jnp.float32),
    }
    return p


if __name__ == "__main__":
    key = jax.random.PRNGKey(0)
    kx, kp = jax.random.split(key)

    x = jax.random.normal(kx, (B, T, D), jnp.float32)
    # mask: keep first 6 key positions, mask the last 2 (value 0 => masked)
    mask = jnp.concatenate(
        [jnp.ones((B, 1, T - 2), jnp.float32), jnp.zeros((B, 1, 2), jnp.float32)],
        axis=-1)
    params = init_params(kp)

    out = encoder_forward(x, mask, params)
    out = jax.block_until_ready(out)

    ref = encoder_reference(x, mask, params)
    assert out.shape == (B, T, D)
    assert bool(jnp.all(jnp.isfinite(out)))
    assert jnp.allclose(out, ref, rtol=2e-2, atol=2e-2), (
        float(jnp.max(jnp.abs(out - ref))))

    print("KERNEL_OK")
</pallas_src>

<mosaic_0001>
module attributes {stable_mosaic.version = 11 : i64} {
  func.func @encoder_kernel(%arg0: i32, %arg1: memref<2x8x32xf32, #tpu.memory_space<vmem>>, %arg2: memref<2x1x8xf32, #tpu.memory_space<vmem>>, %arg3: memref<2x160x128xbf16, #tpu.memory_space<vmem>>, %arg4: memref<2x8x128xf32, #tpu.memory_space<vmem>>, %arg5: memref<2x128xf32, #tpu.memory_space<vmem>>, %arg6: memref<2x256xf32, #tpu.memory_space<vmem>>) attributes {dimension_semantics = [#tpu.dimension_semantics<arbitrary>], iteration_bounds = array<i64: 1>, scalar_prefetch = 0 : i64, scratch_operands = 0 : i64, tpu.core_type = #tpu.core_type<tc>, window_params = [{pipeline_mode = #tpu.pipeline_mode<synchronous>, transform_indices = @transform_0, window_bounds = array<i64: 2, 8, 32>}, {pipeline_mode = #tpu.pipeline_mode<synchronous>, transform_indices = @transform_1, window_bounds = array<i64: 2, 1, 8>}, {pipeline_mode = #tpu.pipeline_mode<synchronous>, transform_indices = @transform_2, window_bounds = array<i64: 2, 160, 128>}, {pipeline_mode = #tpu.pipeline_mode<synchronous>, transform_indices = @transform_3, window_bounds = array<i64: 2, 8, 128>}, {pipeline_mode = #tpu.pipeline_mode<synchronous>, transform_indices = @transform_4, window_bounds = array<i64: 2, 128>}, {pipeline_mode = #tpu.pipeline_mode<synchronous>, transform_indices = @transform_5, window_bounds = array<i64: 2, 256>}]} {
    %c0 = arith.constant 0 : index
    %c0_0 = arith.constant 0 : index
    %c0_1 = arith.constant 0 : index
    %0 = vector.load %arg1[%c0, %c0_0, %c0_1] : memref<2x8x32xf32, #tpu.memory_space<vmem>>, vector<2x8x32xf32>
    %1 = vector.shape_cast %0 : vector<2x8x32xf32> to vector<16x32xf32>
    %c0_2 = arith.constant 0 : index
    %c0_3 = arith.constant 0 : index
    %c0_4 = arith.constant 0 : index
    %2 = vector.load %arg2[%c0_2, %c0_3, %c0_4] : memref<2x1x8xf32, #tpu.memory_space<vmem>>, vector<2x1x8xf32>
    %cst = arith.constant 0.000000e+00 : f32
    %3 = vector.broadcast %cst : f32 to vector<2x1x8xf32>
    %4 = arith.cmpf oeq, %2, %3 : vector<2x1x8xf32>
    %cst_5 = arith.constant -1.000000e+09 : f32
    %cst_6 = arith.constant 0.000000e+00 : f32
    %5 = vector.broadcast %cst_5 : f32 to vector<2x1x8xf32>
    %6 = vector.broadcast %cst_6 : f32 to vector<2x1x8xf32>
    %7 = arith.select %4, %5, %6 : vector<2x1x8xi1>, vector<2x1x8xf32>
    %8 = vector.shape_cast %7 : vector<2x1x8xf32> to vector<2x1x8xf32>
    %9 = vector.broadcast %8 : vector<2x1x8xf32> to vector<2x8x8xf32>
    %c0_7 = arith.constant 0 : index
    %c0_8 = arith.constant 0 : index
    %c0_9 = arith.constant 0 : index
    %10 = vector.load %arg3[%c0_7, %c0_8, %c0_9] : memref<2x160x128xbf16, #tpu.memory_space<vmem>>, vector<1x32x96xbf16>
    %11 = vector.shape_cast %10 : vector<1x32x96xbf16> to vector<32x96xbf16>
    %c0_10 = arith.constant 0 : index
    %c32 = arith.constant 32 : index
    %c0_11 = arith.constant 0 : index
    %12 = vector.load %arg3[%c0_10, %c32, %c0_11] : memref<2x160x128xbf16, #tpu.memory_space<vmem>>, vector<1x32x32xbf16>
    %13 = vector.shape_cast %12 : vector<1x32x32xbf16> to vector<32x32xbf16>
    %c0_12 = arith.constant 0 : index
    %c64 = arith.constant 64 : index
    %c0_13 = arith.constant 0 : index
    %14 = vector.load %arg3[%c0_12, %c64, %c0_13] : memref<2x160x128xbf16, #tpu.memory_space<vmem>>, vector<1x32x64xbf16>
    %15 = vector.shape_cast %14 : vector<1x32x64xbf16> to vector<32x64xbf16>
    %c0_14 = arith.constant 0 : index
    %c96 = arith.constant 96 : index
    %c0_15 = arith.constant 0 : index
    %16 = vector.load %arg3[%c0_14, %c96, %c0_15] : memref<2x160x128xbf16, #tpu.memory_space<vmem>>, vector<1x64x32xbf16>
    %17 = vector.shape_cast %16 : vector<1x64x32xbf16> to vector<64x32xbf16>
    %c0_16 = arith.constant 0 : index
    %c0_17 = arith.constant 0 : index
    %c0_18 = arith.constant 0 : index
    %18 = vector.load %arg4[%c0_16, %c0_17, %c0_18] : memref<2x8x128xf32, #tpu.memory_space<vmem>>, vector<1x1x96xf32>
    %19 = vector.shape_cast %18 : vector<1x1x96xf32> to vector<1x96xf32>
    %c0_19 = arith.constant 0 : index
    %c1 = arith.constant 1 : index
    %c0_20 = arith.constant 0 : index
    %20 = vector.load %arg4[%c0_19, %c1, %c0_20] : memref<2x8x128xf32, #tpu.memory_space<vmem>>, vector<1x1x32xf32>
    %21 = vector.shape_cast %20 : vector<1x1x32xf32> to vector<1x32xf32>
    %c0_21 = arith.constant 0 : index
    %c2 = arith.constant 2 : index
    %c0_22 = arith.constant 0 : index
    %22 = vector.load %arg4[%c0_21, %c2, %c0_22] : memref<2x8x128xf32, #tpu.memory_space<vmem>>, vector<1x1x64xf32>
    %23 = vector.shape_cast %22 : vector<1x1x64xf32> to vector<1x64xf32>
    %c0_23 = arith.constant 0 : index
    %c3 = arith.constant 3 : index
    %c0_24 = arith.constant 0 : index
    %24 = vector.load %arg4[%c0_23, %c3, %c0_24] : memref<2x8x128xf32, #tpu.memory_space<vmem>>, vector<1x1x32xf32>
    %25 = vector.shape_cast %24 : vector<1x1x32xf32> to vector<1x32xf32>
    %c0_25 = arith.constant 0 : index
    %c4 = arith.constant 4 : index
    %c0_26 = arith.constant 0 : index
    %26 = vector.load %arg4[%c0_25, %c4, %c0_26] : memref<2x8x128xf32, #tpu.memory_space<vmem>>, vector<1x1x32xf32>
    %27 = vector.shape_cast %26 : vector<1x1x32xf32> to vector<1x32xf32>
    %c0_27 = arith.constant 0 : index
    %c5 = arith.constant 5 : index
    %c0_28 = arith.constant 0 : index
    %28 = vector.load %arg4[%c0_27, %c5, %c0_28] : memref<2x8x128xf32, #tpu.memory_space<vmem>>, vector<1x1x32xf32>
    %29 = vector.shape_cast %28 : vector<1x1x32xf32> to vector<1x32xf32>
    %c0_29 = arith.constant 0 : index
    %c6 = arith.constant 6 : index
    %c0_30 = arith.constant 0 : index
    %30 = vector.load %arg4[%c0_29, %c6, %c0_30] : memref<2x8x128xf32, #tpu.memory_space<vmem>>, vector<1x1x32xf32>
    %31 = vector.shape_cast %30 : vector<1x1x32xf32> to vector<1x32xf32>
    %c0_31 = arith.constant 0 : index
    %c7 = arith.constant 7 : index
    %c0_32 = arith.constant 0 : index
    %32 = vector.load %arg4[%c0_31, %c7, %c0_32] : memref<2x8x128xf32, #tpu.memory_space<vmem>>, vector<1x1x32xf32>
    %33 = vector.shape_cast %32 : vector<1x1x32xf32> to vector<1x32xf32>
    %cst_33 = arith.constant dense<0.000000e+00> : vector<16xf32>
    %34 = vector.multi_reduction <add>, %1, %cst_33 [1] : vector<16x32xf32> to vector<16xf32>
    %35 = vector.shape_cast %34 : vector<16xf32> to vector<16x1xf32>
    %cst_34 = arith.constant 3.125000e-02 : f32
    %36 = vector.broadcast %cst_34 : f32 to vector<16x1xf32>
    %37 = arith.mulf %35, %36 : vector<16x1xf32>
    %38 = vector.broadcast %37 : vector<16x1xf32> to vector<16x32xf32>
    %39 = arith.subf %1, %38 : vector<16x32xf32>
    %40 = arith.mulf %39, %39 : vector<16x32xf32>
    %cst_35 = arith.constant dense<0.000000e+00> : vector<16xf32>
    %41 = vector.multi_reduction <add>, %40, %cst_35 [1] : vector<16x32xf32> to vector<16xf32>
    %42 = vector.shape_cast %41 : vector<16xf32> to vector<16x1xf32>
    %cst_36 = arith.constant 0.0322580636 : f32
    %43 = vector.broadcast %cst_36 : f32 to vector<16x1xf32>
    %44 = arith.mulf %42, %43 : vector<16x1xf32>
    %45 = math.sqrt %44 : vector<16x1xf32>
    %cst_37 = arith.constant 9.99999997E-7 : f32
    %46 = vector.broadcast %cst_37 : f32 to vector<16x1xf32>
    %47 = arith.addf %45, %46 : vector<16x1xf32>
    %48 = tpu.reciprocal %47 : vector<16x1xf32> -> vector<16x1xf32>
    %49 = vector.broadcast %27 : vector<1x32xf32> to vector<16x32xf32>
    %50 = arith.mulf %49, %39 : vector<16x32xf32>
    %51 = vector.broadcast %48 : vector<16x1xf32> to vector<16x32xf32>
    %52 = arith.mulf %50, %51 : vector<16x32xf32>
    %53 = vector.broadcast %29 : vector<1x32xf32> to vector<16x32xf32>
    %54 = arith.addf %52, %53 : vector<16x32xf32>
    %55 = arith.truncf %54 : vector<16x32xf32> to vector<16x32xbf16>
    %cst_38 = arith.constant dense<0.000000e+00> : vector<16x96xf32>
    %56 = tpu.matmul %55, %11, %cst_38 {dimension_numbers = #tpu.dot_dimension_numbers<[1], [0], [0], [1], [0, 0, 1, 1], [], []>} : vector<16x32xbf16>, vector<32x96xbf16>, vector<16x96xf32> -> vector<16x96xf32>
    %57 = vector.broadcast %19 : vector<1x96xf32> to vector<16x96xf32>
    %58 = arith.addf %56, %57 : vector<16x96xf32>
    %59 = vector.extract_strided_slice %58 {offsets = [0, 0], sizes = [16, 8], strides = [1, 1]} : vector<16x96xf32> to vector<16x8xf32>
    %60 = vector.shape_cast %59 : vector<16x8xf32> to vector<2x8x8xf32>
    %61 = vector.extract_strided_slice %58 {offsets = [0, 32], sizes = [16, 8], strides = [1, 1]} : vector<16x96xf32> to vector<16x8xf32>
    %62 = vector.shape_cast %61 : vector<16x8xf32> to vector<2x8x8xf32>
    %63 = vector.extract_strided_slice %58 {offsets = [0, 64], sizes = [16, 8], strides = [1, 1]} : vector<16x96xf32> to vector<16x8xf32>
    %64 = vector.shape_cast %63 : vector<16x8xf32> to vector<2x8x8xf32>
    "tpu.trace_start"() <{level = 10 : i32, message = "bqe,bke->bqk"}> : () -> ()
    %cst_39 = arith.constant dense<0.000000e+00> : vector<2x8x8xf32>
    %65 = tpu.matmul %60, %62, %cst_39 {dimension_numbers = #tpu.dot_dimension_numbers<[2], [2], [1], [1], [0, 0, 0, 1, 1, 1], [0], [0]>} : vector<2x8x8xf32>, vector<2x8x8xf32>, vector<2x8x8xf32> -> vector<2x8x8xf32>
    "tpu.trace_stop"() : () -> ()
    %66 = arith.addf %65, %9 : vector<2x8x8xf32>
    %cst_40 = arith.constant dense<0xFF800000> : vector<2x8xf32>
    %67 = vector.multi_reduction <maximumf>, %66, %cst_40 [2] : vector<2x8x8xf32> to vector<2x8xf32>
    %68 = vector.shape_cast %67 : vector<2x8xf32> to vector<2x8x1xf32>
    %69 = vector.broadcast %68 : vector<2x8x1xf32> to vector<2x8x8xf32>
    %70 = arith.subf %66, %69 : vector<2x8x8xf32>
    %71 = math.exp %70 : vector<2x8x8xf32>
    %cst_41 = arith.constant dense<0.000000e+00> : vector<2x8xf32>
    %72 = vector.multi_reduction <add>, %71, %cst_41 [2] : vector<2x8x8xf32> to vector<2x8xf32>
    %73 = vector.shape_cast %72 : vector<2x8xf32> to vector<2x8x1xf32>
    %74 = tpu.reciprocal %73 {approx = true} : vector<2x8x1xf32> -> vector<2x8x1xf32>
    %75 = vector.broadcast %74 : vector<2x8x1xf32> to vector<2x8x8xf32>
    %76 = arith.mulf %71, %75 : vector<2x8x8xf32>
    "tpu.trace_start"() <{level = 10 : i32, message = "bqk,bke->bqe"}> : () -> ()
    %cst_42 = arith.constant dense<0.000000e+00> : vector<2x8x8xf32>
    %77 = tpu.matmul %76, %64, %cst_42 {dimension_numbers = #tpu.dot_dimension_numbers<[2], [1], [1], [2], [0, 0, 0, 1, 1, 2], [0], [0]>} : vector<2x8x8xf32>, vector<2x8x8xf32>, vector<2x8x8xf32> -> vector<2x8x8xf32>
    "tpu.trace_stop"() : () -> ()
    %78 = vector.shape_cast %77 : vector<2x8x8xf32> to vector<16x8xf32>
    %79 = vector.extract_strided_slice %58 {offsets = [0, 8], sizes = [16, 8], strides = [1, 1]} : vector<16x96xf32> to vector<16x8xf32>
    %80 = vector.shape_cast %79 : vector<16x8xf32> to vector<2x8x8xf32>
    %81 = vector.extract_strided_slice %58 {offsets = [0, 40], sizes = [16, 8], strides = [1, 1]} : vector<16x96xf32> to vector<16x8xf32>
    %82 = vector.shape_cast %81 : vector<16x8xf32> to vector<2x8x8xf32>
    %83 = vector.extract_strided_slice %58 {offsets = [0, 72], sizes = [16, 8], strides = [1, 1]} : vector<16x96xf32> to vector<16x8xf32>
    %84 = vector.shape_cast %83 : vector<16x8xf32> to vector<2x8x8xf32>
    "tpu.trace_start"() <{level = 10 : i32, message = "bqe,bke->bqk"}> : () -> ()
    %cst_43 = arith.constant dense<0.000000e+00> : vector<2x8x8xf32>
    %85 = tpu.matmul %80, %82, %cst_43 {dimension_numbers = #tpu.dot_dimension_numbers<[2], [2], [1], [1], [0, 0, 0, 1, 1, 1], [0], [0]>} : vector<2x8x8xf32>, vector<2x8x8xf32>, vector<2x8x8xf32> -> vector<2x8x8xf32>
    "tpu.trace_stop"() : () -> ()
    %86 = arith.addf %85, %9 : vector<2x8x8xf32>
    %cst_44 = arith.constant dense<0xFF800000> : vector<2x8xf32>
    %87 = vector.multi_reduction <maximumf>, %86, %cst_44 [2] : vector<2x8x8xf32> to vector<2x8xf32>
    %88 = vector.shape_cast %87 : vector<2x8xf32> to vector<2x8x1xf32>
    %89 = vector.broadcast %88 : vector<2x8x1xf32> to vector<2x8x8xf32>
    %90 = arith.subf %86, %89 : vector<2x8x8xf32>
    %91 = math.exp %90 : vector<2x8x8xf32>
    %cst_45 = arith.constant dense<0.000000e+00> : vector<2x8xf32>
    %92 = vector.multi_reduction <add>, %91, %cst_45 [2] : vector<2x8x8xf32> to vector<2x8xf32>
    %93 = vector.shape_cast %92 : vector<2x8xf32> to vector<2x8x1xf32>
    %94 = tpu.reciprocal %93 {approx = true} : vector<2x8x1xf32> -> vector<2x8x1xf32>
    %95 = vector.broadcast %94 : vector<2x8x1xf32> to vector<2x8x8xf32>
    %96 = arith.mulf %91, %95 : vector<2x8x8xf32>
    "tpu.trace_start"() <{level = 10 : i32, message = "bqk,bke->bqe"}> : () -> ()
    %cst_46 = arith.constant dense<0.000000e+00> : vector<2x8x8xf32>
    %97 = tpu.matmul %96, %84, %cst_46 {dimension_numbers = #tpu.dot_dimension_numbers<[2], [1], [1], [2], [0, 0, 0, 1, 1, 2], [0], [0]>} : vector<2x8x8xf32>, vector<2x8x8xf32>, vector<2x8x8xf32> -> vector<2x8x8xf32>
    "tpu.trace_stop"() : () -> ()
    %98 = vector.shape_cast %97 : vector<2x8x8xf32> to vector<16x8xf32>
    %99 = vector.extract_strided_slice %58 {offsets = [0, 16], sizes = [16, 8], strides = [1, 1]} : vector<16x96xf32> to vector<16x8xf32>
    %100 = vector.shape_cast %99 : vector<16x8xf32> to vector<2x8x8xf32>
    %101 = vector.extract_strided_slice %58 {offsets = [0, 48], sizes = [16, 8], strides = [1, 1]} : vector<16x96xf32> to vector<16x8xf32>
    %102 = vector.shape_cast %101 : vector<16x8xf32> to vector<2x8x8xf32>
    %103 = vector.extract_strided_slice %58 {offsets = [0, 80], sizes = [16, 8], strides = [1, 1]} : vector<16x96xf32> to vector<16x8xf32>
    %104 = vector.shape_cast %103 : vector<16x8xf32> to vector<2x8x8xf32>
    "tpu.trace_start"() <{level = 10 : i32, message = "bqe,bke->bqk"}> : () -> ()
    %cst_47 = arith.constant dense<0.000000e+00> : vector<2x8x8xf32>
    %105 = tpu.matmul %100, %102, %cst_47 {dimension_numbers = #tpu.dot_dimension_numbers<[2], [2], [1], [1], [0, 0, 0, 1, 1, 1], [0], [0]>} : vector<2x8x8xf32>, vector<2x8x8xf32>, vector<2x8x8xf32> -> vector<2x8x8xf32>
    "tpu.trace_stop"() : () -> ()
    %106 = arith.addf %105, %9 : vector<2x8x8xf32>
    %cst_48 = arith.constant dense<0xFF800000> : vector<2x8xf32>
    %107 = vector.multi_reduction <maximumf>, %106, %cst_48 [2] : vector<2x8x8xf32> to vector<2x8xf32>
    %108 = vector.shape_cast %107 : vector<2x8xf32> to vector<2x8x1xf32>
    %109 = vector.broadcast %108 : vector<2x8x1xf32> to vector<2x8x8xf32>
    %110 = arith.subf %106, %109 : vector<2x8x8xf32>
    %111 = math.exp %110 : vector<2x8x8xf32>
    %cst_49 = arith.constant dense<0.000000e+00> : vector<2x8xf32>
    %112 = vector.multi_reduction <add>, %111, %cst_49 [2] : vector<2x8x8xf32> to vector<2x8xf32>
    %113 = vector.shape_cast %112 : vector<2x8xf32> to vector<2x8x1xf32>
    %114 = tpu.reciprocal %113 {approx = true} : vector<2x8x1xf32> -> vector<2x8x1xf32>
    %115 = vector.broadcast %114 : vector<2x8x1xf32> to vector<2x8x8xf32>
    %116 = arith.mulf %111, %115 : vector<2x8x8xf32>
    "tpu.trace_start"() <{level = 10 : i32, message = "bqk,bke->bqe"}> : () -> ()
    %cst_50 = arith.constant dense<0.000000e+00> : vector<2x8x8xf32>
    %117 = tpu.matmul %116, %104, %cst_50 {dimension_numbers = #tpu.dot_dimension_numbers<[2], [1], [1], [2], [0, 0, 0, 1, 1, 2], [0], [0]>} : vector<2x8x8xf32>, vector<2x8x8xf32>, vector<2x8x8xf32> -> vector<2x8x8xf32>
    "tpu.trace_stop"() : () -> ()
    %118 = vector.shape_cast %117 : vector<2x8x8xf32> to vector<16x8xf32>
    %119 = vector.extract_strided_slice %58 {offsets = [0, 24], sizes = [16, 8], strides = [1, 1]} : vector<16x96xf32> to vector<16x8xf32>
    %120 = vector.shape_cast %119 : vector<16x8xf32> to vector<2x8x8xf32>
    %121 = vector.extract_strided_slice %58 {offsets = [0, 56], sizes = [16, 8], strides = [1, 1]} : vector<16x96xf32> to vector<16x8xf32>
    %122 = vector.shape_cast %121 : vector<16x8xf32> to vector<2x8x8xf32>
    %123 = vector.extract_strided_slice %58 {offsets = [0, 88], sizes = [16, 8], strides = [1, 1]} : vector<16x96xf32> to vector<16x8xf32>
    %124 = vector.shape_cast %123 : vector<16x8xf32> to vector<2x8x8xf32>
    "tpu.trace_start"() <{level = 10 : i32, message = "bqe,bke->bqk"}> : () -> ()
    %cst_51 = arith.constant dense<0.000000e+00> : vector<2x8x8xf32>
    %125 = tpu.matmul %120, %122, %cst_51 {dimension_numbers = #tpu.dot_dimension_numbers<[2], [2], [1], [1], [0, 0, 0, 1, 1, 1], [0], [0]>} : vector<2x8x8xf32>, vector<2x8x8xf32>, vector<2x8x8xf32> -> vector<2x8x8xf32>
    "tpu.trace_stop"() : () -> ()
    %126 = arith.addf %125, %9 : vector<2x8x8xf32>
    %cst_52 = arith.constant dense<0xFF800000> : vector<2x8xf32>
    %127 = vector.multi_reduction <maximumf>, %126, %cst_52 [2] : vector<2x8x8xf32> to vector<2x8xf32>
    %128 = vector.shape_cast %127 : vector<2x8xf32> to vector<2x8x1xf32>
    %129 = vector.broadcast %128 : vector<2x8x1xf32> to vector<2x8x8xf32>
    %130 = arith.subf %126, %129 : vector<2x8x8xf32>
    %131 = math.exp %130 : vector<2x8x8xf32>
    %cst_53 = arith.constant dense<0.000000e+00> : vector<2x8xf32>
    %132 = vector.multi_reduction <add>, %131, %cst_53 [2] : vector<2x8x8xf32> to vector<2x8xf32>
    %133 = vector.shape_cast %132 : vector<2x8xf32> to vector<2x8x1xf32>
    %134 = tpu.reciprocal %133 {approx = true} : vector<2x8x1xf32> -> vector<2x8x1xf32>
    %135 = vector.broadcast %134 : vector<2x8x1xf32> to vector<2x8x8xf32>
    %136 = arith.mulf %131, %135 : vector<2x8x8xf32>
    "tpu.trace_start"() <{level = 10 : i32, message = "bqk,bke->bqe"}> : () -> ()
    %cst_54 = arith.constant dense<0.000000e+00> : vector<2x8x8xf32>
    %137 = tpu.matmul %136, %124, %cst_54 {dimension_numbers = #tpu.dot_dimension_numbers<[2], [1], [1], [2], [0, 0, 0, 1, 1, 2], [0], [0]>} : vector<2x8x8xf32>, vector<2x8x8xf32>, vector<2x8x8xf32> -> vector<2x8x8xf32>
    "tpu.trace_stop"() : () -> ()
    %138 = vector.shape_cast %137 : vector<2x8x8xf32> to vector<16x8xf32>
    %139 = tpu.concatenate %78, %98, %118, %138 in 1 : vector<16x8xf32>, vector<16x8xf32>, vector<16x8xf32>, vector<16x8xf32> -> vector<16x32xf32>
    %140 = arith.truncf %139 : vector<16x32xf32> to vector<16x32xbf16>
    %cst_55 = arith.constant dense<0.000000e+00> : vector<16x32xf32>
    %141 = tpu.matmul %140, %13, %cst_55 {dimension_numbers = #tpu.dot_dimension_numbers<[1], [0], [0], [1], [0, 0, 1, 1], [], []>} : vector<16x32xbf16>, vector<32x32xbf16>, vector<16x32xf32> -> vector<16x32xf32>
    %142 = vector.broadcast %21 : vector<1x32xf32> to vector<16x32xf32>
    %143 = arith.addf %141, %142 : vector<16x32xf32>
    %144 = arith.addf %1, %143 : vector<16x32xf32>
    %cst_56 = arith.constant dense<0.000000e+00> : vector<16xf32>
    %145 = vector.multi_reduction <add>, %144, %cst_56 [1] : vector<16x32xf32> to vector<16xf32>
    %146 = vector.shape_cast %145 : vector<16xf32> to vector<16x1xf32>
    %cst_57 = arith.constant 3.125000e-02 : f32
    %147 = vector.broadcast %cst_57 : f32 to vector<16x1xf32>
    %148 = arith.mulf %146, %147 : vector<16x1xf32>
    %149 = vector.broadcast %148 : vector<16x1xf32> to vector<16x32xf32>
    %150 = arith.subf %144, %149 : vector<16x32xf32>
    %151 = arith.mulf %150, %150 : vector<16x32xf32>
    %cst_58 = arith.constant dense<0.000000e+00> : vector<16xf32>
    %152 = vector.multi_reduction <add>, %151, %cst_58 [1] : vector<16x32xf32> to vector<16xf32>
    %153 = vector.shape_cast %152 : vector<16xf32> to vector<16x1xf32>
    %cst_59 = arith.constant 0.0322580636 : f32
    %154 = vector.broadcast %cst_59 : f32 to vector<16x1xf32>
    %155 = arith.mulf %153, %154 : vector<16x1xf32>
    %156 = math.sqrt %155 : vector<16x1xf32>
    %cst_60 = arith.constant 9.99999997E-7 : f32
    %157 = vector.broadcast %cst_60 : f32 to vector<16x1xf32>
    %158 = arith.addf %156, %157 : vector<16x1xf32>
    %159 = tpu.reciprocal %158 : vector<16x1xf32> -> vector<16x1xf32>
    %160 = vector.broadcast %31 : vector<1x32xf32> to vector<16x32xf32>
    %161 = arith.mulf %160, %150 : vector<16x32xf32>
    %162 = vector.broadcast %159 : vector<16x1xf32> to vector<16x32xf32>
    %163 = arith.mulf %161, %162 : vector<16x32xf32>
    %164 = vector.broadcast %33 : vector<1x32xf32> to vector<16x32xf32>
    %165 = arith.addf %163, %164 : vector<16x32xf32>
    %166 = arith.truncf %165 : vector<16x32xf32> to vector<16x32xbf16>
    %cst_61 = arith.constant dense<0.000000e+00> : vector<16x64xf32>
    %167 = tpu.matmul %166, %15, %cst_61 {dimension_numbers = #tpu.dot_dimension_numbers<[1], [0], [0], [1], [0, 0, 1, 1], [], []>} : vector<16x32xbf16>, vector<32x64xbf16>, vector<16x64xf32> -> vector<16x64xf32>
    %168 = vector.broadcast %23 : vector<1x64xf32> to vector<16x64xf32>
    %169 = arith.addf %167, %168 : vector<16x64xf32>
    %cst_62 = arith.constant 0.000000e+00 : f32
    %170 = vector.broadcast %cst_62 : f32 to vector<16x64xf32>
    %171 = arith.maximumf %169, %170 : vector<16x64xf32>
    %172 = arith.truncf %171 : vector<16x64xf32> to vector<16x64xbf16>
    %cst_63 = arith.constant dense<0.000000e+00> : vector<16x32xf32>
    %173 = tpu.matmul %172, %17, %cst_63 {dimension_numbers = #tpu.dot_dimension_numbers<[1], [0], [0], [1], [0, 0, 1, 1], [], []>} : vector<16x64xbf16>, vector<64x32xbf16>, vector<16x32xf32> -> vector<16x32xf32>
    %174 = arith.addf %144, %173 : vector<16x32xf32>
    %175 = vector.broadcast %25 : vector<1x32xf32> to vector<16x32xf32>
    %176 = arith.addf %174, %175 : vector<16x32xf32>
    %c1_64 = arith.constant 1 : index
    %c0_65 = arith.constant 0 : index
    %c0_66 = arith.constant 0 : index
    %177 = vector.load %arg3[%c1_64, %c0_65, %c0_66] : memref<2x160x128xbf16, #tpu.memory_space<vmem>>, vector<1x32x96xbf16>
    %178 = vector.shape_cast %177 : vector<1x32x96xbf16> to vector<32x96xbf16>
    %c1_67 = arith.constant 1 : index
    %c32_68 = arith.constant 32 : index
    %c0_69 = arith.constant 0 : index
    %179 = vector.load %arg3[%c1_67, %c32_68, %c0_69] : memref<2x160x128xbf16, #tpu.memory_space<vmem>>, vector<1x32x32xbf16>
    %180 = vector.shape_cast %179 : vector<1x32x32xbf16> to vector<32x32xbf16>
    %c1_70 = arith.constant 1 : index
    %c64_71 = arith.constant 64 : index
    %c0_72 = arith.constant 0 : index
    %181 = vector.load %arg3[%c1_70, %c64_71, %c0_72] : memref<2x160x128xbf16, #tpu.memory_space<vmem>>, vector<1x32x64xbf16>
    %182 = vector.shape_cast %181 : vector<1x32x64xbf16> to vector<32x64xbf16>
    %c1_73 = arith.constant 1 : index
    %c96_74 = arith.constant 96 : index
    %c0_75 = arith.constant 0 : index
    %183 = vector.load %arg3[%c1_73, %c96_74, %c0_75] : memref<2x160x128xbf16, #tpu.memory_space<vmem>>, vector<1x64x32xbf16>
    %184 = vector.shape_cast %183 : vector<1x64x32xbf16> to vector<64x32xbf16>
    %c1_76 = arith.constant 1 : index
    %c0_77 = arith.constant 0 : index
    %c0_78 = arith.constant 0 : index
    %185 = vector.load %arg4[%c1_76, %c0_77, %c0_78] : memref<2x8x128xf32, #tpu.memory_space<vmem>>, vector<1x1x96xf32>
    %186 = vector.shape_cast %185 : vector<1x1x96xf32> to vector<1x96xf32>
    %c1_79 = arith.constant 1 : index
    %c1_80 = arith.constant 1 : index
    %c0_81 = arith.constant 0 : index
    %187 = vector.load %arg4[%c1_79, %c1_80, %c0_81] : memref<2x8x128xf32, #tpu.memory_space<vmem>>, vector<1x1x32xf32>
    %188 = vector.shape_cast %187 : vector<1x1x32xf32> to vector<1x32xf32>
    %c1_82 = arith.constant 1 : index
    %c2_83 = arith.constant 2 : index
    %c0_84 = arith.constant 0 : index
    %189 = vector.load %arg4[%c1_82, %c2_83, %c0_84] : memref<2x8x128xf32, #tpu.memory_space<vmem>>, vector<1x1x64xf32>
    %190 = vector.shape_cast %189 : vector<1x1x64xf32> to vector<1x64xf32>
    %c1_85 = arith.constant 1 : index
    %c3_86 = arith.constant 3 : index
    %c0_87 = arith.constant 0 : index
    %191 = vector.load %arg4[%c1_85, %c3_86, %c0_87] : memref<2x8x128xf32, #tpu.memory_space<vmem>>, vector<1x1x32xf32>
    %192 = vector.shape_cast %191 : vector<1x1x32xf32> to vector<1x32xf32>
    %c1_88 = arith.constant 1 : index
    %c4_89 = arith.constant 4 : index
    %c0_90 = arith.constant 0 : index
    %193 = vector.load %arg4[%c1_88, %c4_89, %c0_90] : memref<2x8x128xf32, #tpu.memory_space<vmem>>, vector<1x1x32xf32>
    %194 = vector.shape_cast %193 : vector<1x1x32xf32> to vector<1x32xf32>
    %c1_91 = arith.constant 1 : index
    %c5_92 = arith.constant 5 : index
    %c0_93 = arith.constant 0 : index
    %195 = vector.load %arg4[%c1_91, %c5_92, %c0_93] : memref<2x8x128xf32, #tpu.memory_space<vmem>>, vector<1x1x32xf32>
    %196 = vector.shape_cast %195 : vector<1x1x32xf32> to vector<1x32xf32>
    %c1_94 = arith.constant 1 : index
    %c6_95 = arith.constant 6 : index
    %c0_96 = arith.constant 0 : index
    %197 = vector.load %arg4[%c1_94, %c6_95, %c0_96] : memref<2x8x128xf32, #tpu.memory_space<vmem>>, vector<1x1x32xf32>
    %198 = vector.shape_cast %197 : vector<1x1x32xf32> to vector<1x32xf32>
    %c1_97 = arith.constant 1 : index
    %c7_98 = arith.constant 7 : index
    %c0_99 = arith.constant 0 : index
    %199 = vector.load %arg4[%c1_97, %c7_98, %c0_99] : memref<2x8x128xf32, #tpu.memory_space<vmem>>, vector<1x1x32xf32>
    %200 = vector.shape_cast %199 : vector<1x1x32xf32> to vector<1x32xf32>
    %cst_100 = arith.constant dense<0.000000e+00> : vector<16xf32>
    %201 = vector.multi_reduction <add>, %176, %cst_100 [1] : vector<16x32xf32> to vector<16xf32>
    %202 = vector.shape_cast %201 : vector<16xf32> to vector<16x1xf32>
    %cst_101 = arith.constant 3.125000e-02 : f32
    %203 = vector.broadcast %cst_101 : f32 to vector<16x1xf32>
    %204 = arith.mulf %202, %203 : vector<16x1xf32>
    %205 = vector.broadcast %204 : vector<16x1xf32> to vector<16x32xf32>
    %206 = arith.subf %176, %205 : vector<16x32xf32>
    %207 = arith.mulf %206, %206 : vector<16x32xf32>
    %cst_102 = arith.constant dense<0.000000e+00> : vector<16xf32>
    %208 = vector.multi_reduction <add>, %207, %cst_102 [1] : vector<16x32xf32> to vector<16xf32>
    %209 = vector.shape_cast %208 : vector<16xf32> to vector<16x1xf32>
    %cst_103 = arith.constant 0.0322580636 : f32
    %210 = vector.broadcast %cst_103 : f32 to vector<16x1xf32>
    %211 = arith.mulf %209, %210 : vector<16x1xf32>
    %212 = math.sqrt %211 : vector<16x1xf32>
    %cst_104 = arith.constant 9.99999997E-7 : f32
    %213 = vector.broadcast %cst_104 : f32 to vector<16x1xf32>
    %214 = arith.addf %212, %213 : vector<16x1xf32>
    %215 = tpu.reciprocal %214 : vector<16x1xf32> -> vector<16x1xf32>
    %216 = vector.broadcast %194 : vector<1x32xf32> to vector<16x32xf32>
    %217 = arith.mulf %216, %206 : vector<16x32xf32>
    %218 = vector.broadcast %215 : vector<16x1xf32> to vector<16x32xf32>
    %219 = arith.mulf %217, %218 : vector<16x32xf32>
    %220 = vector.broadcast %196 : vector<1x32xf32> to vector<16x32xf32>
    %221 = arith.addf %219, %220 : vector<16x32xf32>
    %222 = arith.truncf %221 : vector<16x32xf32> to vector<16x32xbf16>
    %cst_105 = arith.constant dense<0.000000e+00> : vector<16x96xf32>
    %223 = tpu.matmul %222, %178, %cst_105 {dimension_numbers = #tpu.dot_dimension_numbers<[1], [0], [0], [1], [0, 0, 1, 1], [], []>} : vector<16x32xbf16>, vector<32x96xbf16>, vector<16x96xf32> -> vector<16x96xf32>
    %224 = vector.broadcast %186 : vector<1x96xf32> to vector<16x96xf32>
    %225 = arith.addf %223, %224 : vector<16x96xf32>
    %226 = vector.extract_strided_slice %225 {offsets = [0, 0], sizes = [16, 8], strides = [1, 1]} : vector<16x96xf32> to vector<16x8xf32>
    %227 = vector.shape_cast %226 : vector<16x8xf32> to vector<2x8x8xf32>
    %228 = vector.extract_strided_slice %225 {offsets = [0, 32], sizes = [16, 8], strides = [1, 1]} : vector<16x96xf32> to vector<16x8xf32>
    %229 = vector.shape_cast %228 : vector<16x8xf32> to vector<2x8x8xf32>
    %230 = vector.extract_strided_slice %225 {offsets = [0, 64], sizes = [16, 8], strides = [1, 1]} : vector<16x96xf32> to vector<16x8xf32>
    %231 = vector.shape_cast %230 : vector<16x8xf32> to vector<2x8x8xf32>
    "tpu.trace_start"() <{level = 10 : i32, message = "bqe,bke->bqk"}> : () -> ()
    %cst_106 = arith.constant dense<0.000000e+00> : vector<2x8x8xf32>
    %232 = tpu.matmul %227, %229, %cst_106 {dimension_numbers = #tpu.dot_dimension_numbers<[2], [2], [1], [1], [0, 0, 0, 1, 1, 1], [0], [0]>} : vector<2x8x8xf32>, vector<2x8x8xf32>, vector<2x8x8xf32> -> vector<2x8x8xf32>
    "tpu.trace_stop"() : () -> ()
    %233 = arith.addf %232, %9 : vector<2x8x8xf32>
    %cst_107 = arith.constant dense<0xFF800000> : vector<2x8xf32>
    %234 = vector.multi_reduction <maximumf>, %233, %cst_107 [2] : vector<2x8x8xf32> to vector<2x8xf32>
    %235 = vector.shape_cast %234 : vector<2x8xf32> to vector<2x8x1xf32>
    %236 = vector.broadcast %235 : vector<2x8x1xf32> to vector<2x8x8xf32>
    %237 = arith.subf %233, %236 : vector<2x8x8xf32>
    %238 = math.exp %237 : vector<2x8x8xf32>
    %cst_108 = arith.constant dense<0.000000e+00> : vector<2x8xf32>
    %239 = vector.multi_reduction <add>, %238, %cst_108 [2] : vector<2x8x8xf32> to vector<2x8xf32>
    %240 = vector.shape_cast %239 : vector<2x8xf32> to vector<2x8x1xf32>
    %241 = tpu.reciprocal %240 {approx = true} : vector<2x8x1xf32> -> vector<2x8x1xf32>
    %242 = vector.broadcast %241 : vector<2x8x1xf32> to vector<2x8x8xf32>
    %243 = arith.mulf %238, %242 : vector<2x8x8xf32>
    "tpu.trace_start"() <{level = 10 : i32, message = "bqk,bke->bqe"}> : () -> ()
    %cst_109 = arith.constant dense<0.000000e+00> : vector<2x8x8xf32>
    %244 = tpu.matmul %243, %231, %cst_109 {dimension_numbers = #tpu.dot_dimension_numbers<[2], [1], [1], [2], [0, 0, 0, 1, 1, 2], [0], [0]>} : vector<2x8x8xf32>, vector<2x8x8xf32>, vector<2x8x8xf32> -> vector<2x8x8xf32>
    "tpu.trace_stop"() : () -> ()
    %245 = vector.shape_cast %244 : vector<2x8x8xf32> to vector<16x8xf32>
    %246 = vector.extract_strided_slice %225 {offsets = [0, 8], sizes = [16, 8], strides = [1, 1]} : vector<16x96xf32> to vector<16x8xf32>
    %247 = vector.shape_cast %246 : vector<16x8xf32> to vector<2x8x8xf32>
    %248 = vector.extract_strided_slice %225 {offsets = [0, 40], sizes = [16, 8], strides = [1, 1]} : vector<16x96xf32> to vector<16x8xf32>
    %249 = vector.shape_cast %248 : vector<16x8xf32> to vector<2x8x8xf32>
    %250 = vector.extract_strided_slice %225 {offsets = [0, 72], sizes = [16, 8], strides = [1, 1]} : vector<16x96xf32> to vector<16x8xf32>
    %251 = vector.shape_cast %250 : vector<16x8xf32> to vector<2x8x8xf32>
    "tpu.trace_start"() <{level = 10 : i32, message = "bqe,bke->bqk"}> : () -> ()
    %cst_110 = arith.constant dense<0.000000e+00> : vector<2x8x8xf32>
    %252 = tpu.matmul %247, %249, %cst_110 {dimension_numbers = #tpu.dot_dimension_numbers<[2], [2], [1], [1], [0, 0, 0, 1, 1, 1], [0], [0]>} : vector<2x8x8xf32>, vector<2x8x8xf32>, vector<2x8x8xf32> -> vector<2x8x8xf32>
    "tpu.trace_stop"() : () -> ()
    %253 = arith.addf %252, %9 : vector<2x8x8xf32>
    %cst_111 = arith.constant dense<0xFF800000> : vector<2x8xf32>
    %254 = vector.multi_reduction <maximumf>, %253, %cst_111 [2] : vector<2x8x8xf32> to vector<2x8xf32>
    %255 = vector.shape_cast %254 : vector<2x8xf32> to vector<2x8x1xf32>
    %256 = vector.broadcast %255 : vector<2x8x1xf32> to vector<2x8x8xf32>
    %257 = arith.subf %253, %256 : vector<2x8x8xf32>
    %258 = math.exp %257 : vector<2x8x8xf32>
    %cst_112 = arith.constant dense<0.000000e+00> : vector<2x8xf32>
    %259 = vector.multi_reduction <add>, %258, %cst_112 [2] : vector<2x8x8xf32> to vector<2x8xf32>
    %260 = vector.shape_cast %259 : vector<2x8xf32> to vector<2x8x1xf32>
    %261 = tpu.reciprocal %260 {approx = true} : vector<2x8x1xf32> -> vector<2x8x1xf32>
    %262 = vector.broadcast %261 : vector<2x8x1xf32> to vector<2x8x8xf32>
    %263 = arith.mulf %258, %262 : vector<2x8x8xf32>
    "tpu.trace_start"() <{level = 10 : i32, message = "bqk,bke->bqe"}> : () -> ()
    %cst_113 = arith.constant dense<0.000000e+00> : vector<2x8x8xf32>
    %264 = tpu.matmul %263, %251, %cst_113 {dimension_numbers = #tpu.dot_dimension_numbers<[2], [1], [1], [2], [0, 0, 0, 1, 1, 2], [0], [0]>} : vector<2x8x8xf32>, vector<2x8x8xf32>, vector<2x8x8xf32> -> vector<2x8x8xf32>
    "tpu.trace_stop"() : () -> ()
    %265 = vector.shape_cast %264 : vector<2x8x8xf32> to vector<16x8xf32>
    %266 = vector.extract_strided_slice %225 {offsets = [0, 16], sizes = [16, 8], strides = [1, 1]} : vector<16x96xf32> to vector<16x8xf32>
    %267 = vector.shape_cast %266 : vector<16x8xf32> to vector<2x8x8xf32>
    %268 = vector.extract_strided_slice %225 {offsets = [0, 48], sizes = [16, 8], strides = [1, 1]} : vector<16x96xf32> to vector<16x8xf32>
    %269 = vector.shape_cast %268 : vector<16x8xf32> to vector<2x8x8xf32>
    %270 = vector.extract_strided_slice %225 {offsets = [0, 80], sizes = [16, 8], strides = [1, 1]} : vector<16x96xf32> to vector<16x8xf32>
    %271 = vector.shape_cast %270 : vector<16x8xf32> to vector<2x8x8xf32>
    "tpu.trace_start"() <{level = 10 : i32, message = "bqe,bke->bqk"}> : () -> ()
    %cst_114 = arith.constant dense<0.000000e+00> : vector<2x8x8xf32>
    %272 = tpu.matmul %267, %269, %cst_114 {dimension_numbers = #tpu.dot_dimension_numbers<[2], [2], [1], [1], [0, 0, 0, 1, 1, 1], [0], [0]>} : vector<2x8x8xf32>, vector<2x8x8xf32>, vector<2x8x8xf32> -> vector<2x8x8xf32>
    "tpu.trace_stop"() : () -> ()
    %273 = arith.addf %272, %9 : vector<2x8x8xf32>
    %cst_115 = arith.constant dense<0xFF800000> : vector<2x8xf32>
    %274 = vector.multi_reduction <maximumf>, %273, %cst_115 [2] : vector<2x8x8xf32> to vector<2x8xf32>
    %275 = vector.shape_cast %274 : vector<2x8xf32> to vector<2x8x1xf32>
    %276 = vector.broadcast %275 : vector<2x8x1xf32> to vector<2x8x8xf32>
    %277 = arith.subf %273, %276 : vector<2x8x8xf32>
    %278 = math.exp %277 : vector<2x8x8xf32>
    %cst_116 = arith.constant dense<0.000000e+00> : vector<2x8xf32>
    %279 = vector.multi_reduction <add>, %278, %cst_116 [2] : vector<2x8x8xf32> to vector<2x8xf32>
    %280 = vector.shape_cast %279 : vector<2x8xf32> to vector<2x8x1xf32>
    %281 = tpu.reciprocal %280 {approx = true} : vector<2x8x1xf32> -> vector<2x8x1xf32>
    %282 = vector.broadcast %281 : vector<2x8x1xf32> to vector<2x8x8xf32>
    %283 = arith.mulf %278, %282 : vector<2x8x8xf32>
    "tpu.trace_start"() <{level = 10 : i32, message = "bqk,bke->bqe"}> : () -> ()
    %cst_117 = arith.constant dense<0.000000e+00> : vector<2x8x8xf32>
    %284 = tpu.matmul %283, %271, %cst_117 {dimension_numbers = #tpu.dot_dimension_numbers<[2], [1], [1], [2], [0, 0, 0, 1, 1, 2], [0], [0]>} : vector<2x8x8xf32>, vector<2x8x8xf32>, vector<2x8x8xf32> -> vector<2x8x8xf32>
    "tpu.trace_stop"() : () -> ()
    %285 = vector.shape_cast %284 : vector<2x8x8xf32> to vector<16x8xf32>
    %286 = vector.extract_strided_slice %225 {offsets = [0, 24], sizes = [16, 8], strides = [1, 1]} : vector<16x96xf32> to vector<16x8xf32>
    %287 = vector.shape_cast %286 : vector<16x8xf32> to vector<2x8x8xf32>
    %288 = vector.extract_strided_slice %225 {offsets = [0, 56], sizes = [16, 8], strides = [1, 1]} : vector<16x96xf32> to vector<16x8xf32>
    %289 = vector.shape_cast %288 : vector<16x8xf32> to vector<2x8x8xf32>
    %290 = vector.extract_strided_slice %225 {offsets = [0, 88], sizes = [16, 8], strides = [1, 1]} : vector<16x96xf32> to vector<16x8xf32>
    %291 = vector.shape_cast %290 : vector<16x8xf32> to vector<2x8x8xf32>
    "tpu.trace_start"() <{level = 10 : i32, message = "bqe,bke->bqk"}> : () -> ()
    %cst_118 = arith.constant dense<0.000000e+00> : vector<2x8x8xf32>
    %292 = tpu.matmul %287, %289, %cst_118 {dimension_numbers = #tpu.dot_dimension_numbers<[2], [2], [1], [1], [0, 0, 0, 1, 1, 1], [0], [0]>} : vector<2x8x8xf32>, vector<2x8x8xf32>, vector<2x8x8xf32> -> vector<2x8x8xf32>
    "tpu.trace_stop"() : () -> ()
    %293 = arith.addf %292, %9 : vector<2x8x8xf32>
    %cst_119 = arith.constant dense<0xFF800000> : vector<2x8xf32>
    %294 = vector.multi_reduction <maximumf>, %293, %cst_119 [2] : vector<2x8x8xf32> to vector<2x8xf32>
    %295 = vector.shape_cast %294 : vector<2x8xf32> to vector<2x8x1xf32>
    %296 = vector.broadcast %295 : vector<2x8x1xf32> to vector<2x8x8xf32>
    %297 = arith.subf %293, %296 : vector<2x8x8xf32>
    %298 = math.exp %297 : vector<2x8x8xf32>
    %cst_120 = arith.constant dense<0.000000e+00> : vector<2x8xf32>
    %299 = vector.multi_reduction <add>, %298, %cst_120 [2] : vector<2x8x8xf32> to vector<2x8xf32>
    %300 = vector.shape_cast %299 : vector<2x8xf32> to vector<2x8x1xf32>
    %301 = tpu.reciprocal %300 {approx = true} : vector<2x8x1xf32> -> vector<2x8x1xf32>
    %302 = vector.broadcast %301 : vector<2x8x1xf32> to vector<2x8x8xf32>
    %303 = arith.mulf %298, %302 : vector<2x8x8xf32>
    "tpu.trace_start"() <{level = 10 : i32, message = "bqk,bke->bqe"}> : () -> ()
    %cst_121 = arith.constant dense<0.000000e+00> : vector<2x8x8xf32>
    %304 = tpu.matmul %303, %291, %cst_121 {dimension_numbers = #tpu.dot_dimension_numbers<[2], [1], [1], [2], [0, 0, 0, 1, 1, 2], [0], [0]>} : vector<2x8x8xf32>, vector<2x8x8xf32>, vector<2x8x8xf32> -> vector<2x8x8xf32>
    "tpu.trace_stop"() : () -> ()
    %305 = vector.shape_cast %304 : vector<2x8x8xf32> to vector<16x8xf32>
    %306 = tpu.concatenate %245, %265, %285, %305 in 1 : vector<16x8xf32>, vector<16x8xf32>, vector<16x8xf32>, vector<16x8xf32> -> vector<16x32xf32>
    %307 = arith.truncf %306 : vector<16x32xf32> to vector<16x32xbf16>
    %cst_122 = arith.constant dense<0.000000e+00> : vector<16x32xf32>
    %308 = tpu.matmul %307, %180, %cst_122 {dimension_numbers = #tpu.dot_dimension_numbers<[1], [0], [0], [1], [0, 0, 1, 1], [], []>} : vector<16x32xbf16>, vector<32x32xbf16>, vector<16x32xf32> -> vector<16x32xf32>
    %309 = vector.broadcast %188 : vector<1x32xf32> to vector<16x32xf32>
    %310 = arith.addf %308, %309 : vector<16x32xf32>
    %311 = arith.addf %176, %310 : vector<16x32xf32>
    %cst_123 = arith.constant dense<0.000000e+00> : vector<16xf32>
    %312 = vector.multi_reduction <add>, %311, %cst_123 [1] : vector<16x32xf32> to vector<16xf32>
    %313 = vector.shape_cast %312 : vector<16xf32> to vector<16x1xf32>
    %cst_124 = arith.constant 3.125000e-02 : f32
    %314 = vector.broadcast %cst_124 : f32 to vector<16x1xf32>
    %315 = arith.mulf %313, %314 : vector<16x1xf32>
    %316 = vector.broadcast %315 : vector<16x1xf32> to vector<16x32xf32>
    %317 = arith.subf %311, %316 : vector<16x32xf32>
    %318 = arith.mulf %317, %317 : vector<16x32xf32>
    %cst_125 = arith.constant dense<0.000000e+00> : vector<16xf32>
    %319 = vector.multi_reduction <add>, %318, %cst_125 [1] : vector<16x32xf32> to vector<16xf32>
    %320 = vector.shape_cast %319 : vector<16xf32> to vector<16x1xf32>
    %cst_126 = arith.constant 0.0322580636 : f32
    %321 = vector.broadcast %cst_126 : f32 to vector<16x1xf32>
    %322 = arith.mulf %320, %321 : vector<16x1xf32>
    %323 = math.sqrt %322 : vector<16x1xf32>
    %cst_127 = arith.constant 9.99999997E-7 : f32
    %324 = vector.broadcast %cst_127 : f32 to vector<16x1xf32>
    %325 = arith.addf %323, %324 : vector<16x1xf32>
    %326 = tpu.reciprocal %325 : vector<16x1xf32> -> vector<16x1xf32>
    %327 = vector.broadcast %198 : vector<1x32xf32> to vector<16x32xf32>
    %328 = arith.mulf %327, %317 : vector<16x32xf32>
    %329 = vector.broadcast %326 : vector<16x1xf32> to vector<16x32xf32>
    %330 = arith.mulf %328, %329 : vector<16x32xf32>
    %331 = vector.broadcast %200 : vector<1x32xf32> to vector<16x32xf32>
    %332 = arith.addf %330, %331 : vector<16x32xf32>
    %333 = arith.truncf %332 : vector<16x32xf32> to vector<16x32xbf16>
    %cst_128 = arith.constant dense<0.000000e+00> : vector<16x64xf32>
    %334 = tpu.matmul %333, %182, %cst_128 {dimension_numbers = #tpu.dot_dimension_numbers<[1], [0], [0], [1], [0, 0, 1, 1], [], []>} : vector<16x32xbf16>, vector<32x64xbf16>, vector<16x64xf32> -> vector<16x64xf32>
    %335 = vector.broadcast %190 : vector<1x64xf32> to vector<16x64xf32>
    %336 = arith.addf %334, %335 : vector<16x64xf32>
    %cst_129 = arith.constant 0.000000e+00 : f32
    %337 = vector.broadcast %cst_129 : f32 to vector<16x64xf32>
    %338 = arith.maximumf %336, %337 : vector<16x64xf32>
    %339 = arith.truncf %338 : vector<16x64xf32> to vector<16x64xbf16>
    %cst_130 = arith.constant dense<0.000000e+00> : vector<16x32xf32>
    %340 = tpu.matmul %339, %184, %cst_130 {dimension_numbers = #tpu.dot_dimension_numbers<[1], [0], [0], [1], [0, 0, 1, 1], [], []>} : vector<16x64xbf16>, vector<64x32xbf16>, vector<16x32xf32> -> vector<16x32xf32>
    %341 = arith.addf %311, %340 : vector<16x32xf32>
    %342 = vector.broadcast %192 : vector<1x32xf32> to vector<16x32xf32>
    %343 = arith.addf %341, %342 : vector<16x32xf32>
    %c0_131 = arith.constant 0 : index
    %c0_132 = arith.constant 0 : index
    %344 = vector.load %arg5[%c0_131, %c0_132] : memref<2x128xf32, #tpu.memory_space<vmem>>, vector<1x32xf32>
    %c1_133 = arith.constant 1 : index
    %c0_134 = arith.constant 0 : index
    %345 = vector.load %arg5[%c1_133, %c0_134] : memref<2x128xf32, #tpu.memory_space<vmem>>, vector<1x32xf32>
    %cst_135 = arith.constant dense<0.000000e+00> : vector<16xf32>
    %346 = vector.multi_reduction <add>, %343, %cst_135 [1] : vector<16x32xf32> to vector<16xf32>
    %347 = vector.shape_cast %346 : vector<16xf32> to vector<16x1xf32>
    %cst_136 = arith.constant 3.125000e-02 : f32
    %348 = vector.broadcast %cst_136 : f32 to vector<16x1xf32>
    %349 = arith.mulf %347, %348 : vector<16x1xf32>
    %350 = vector.broadcast %349 : vector<16x1xf32> to vector<16x32xf32>
    %351 = arith.subf %343, %350 : vector<16x32xf32>
    %352 = arith.mulf %351, %351 : vector<16x32xf32>
    %cst_137 = arith.constant dense<0.000000e+00> : vector<16xf32>
    %353 = vector.multi_reduction <add>, %352, %cst_137 [1] : vector<16x32xf32> to vector<16xf32>
    %354 = vector.shape_cast %353 : vector<16xf32> to vector<16x1xf32>
    %cst_138 = arith.constant 0.0322580636 : f32
    %355 = vector.broadcast %cst_138 : f32 to vector<16x1xf32>
    %356 = arith.mulf %354, %355 : vector<16x1xf32>
    %357 = math.sqrt %356 : vector<16x1xf32>
    %cst_139 = arith.constant 9.99999997E-7 : f32
    %358 = vector.broadcast %cst_139 : f32 to vector<16x1xf32>
    %359 = arith.addf %357, %358 : vector<16x1xf32>
    %360 = tpu.reciprocal %359 : vector<16x1xf32> -> vector<16x1xf32>
    %361 = vector.broadcast %344 : vector<1x32xf32> to vector<16x32xf32>
    %362 = arith.mulf %361, %351 : vector<16x32xf32>
    %363 = vector.broadcast %360 : vector<16x1xf32> to vector<16x32xf32>
    %364 = arith.mulf %362, %363 : vector<16x32xf32>
    %365 = vector.broadcast %345 : vector<1x32xf32> to vector<16x32xf32>
    %366 = arith.addf %364, %365 : vector<16x32xf32>
    %367 = vector.shape_cast %366 : vector<16x32xf32> to vector<2x8x32xf32>
    %368 = vector.extract_strided_slice %367 {offsets = [0, 0, 0], sizes = [2, 1, 32], strides = [1, 1, 1]} : vector<2x8x32xf32> to vector<2x1x32xf32>
    %369 = vector.shape_cast %368 : vector<2x1x32xf32> to vector<2x32xf32>
    %370 = vector.extract_strided_slice %367 {offsets = [0, 1, 0], sizes = [2, 1, 32], strides = [1, 1, 1]} : vector<2x8x32xf32> to vector<2x1x32xf32>
    %371 = vector.shape_cast %370 : vector<2x1x32xf32> to vector<2x32xf32>
    %372 = vector.extract_strided_slice %367 {offsets = [0, 2, 0], sizes = [2, 1, 32], strides = [1, 1, 1]} : vector<2x8x32xf32> to vector<2x1x32xf32>
    %373 = vector.shape_cast %372 : vector<2x1x32xf32> to vector<2x32xf32>
    %374 = vector.extract_strided_slice %367 {offsets = [0, 3, 0], sizes = [2, 1, 32], strides = [1, 1, 1]} : vector<2x8x32xf32> to vector<2x1x32xf32>
    %375 = vector.shape_cast %374 : vector<2x1x32xf32> to vector<2x32xf32>
    %376 = vector.extract_strided_slice %367 {offsets = [0, 4, 0], sizes = [2, 1, 32], strides = [1, 1, 1]} : vector<2x8x32xf32> to vector<2x1x32xf32>
    %377 = vector.shape_cast %376 : vector<2x1x32xf32> to vector<2x32xf32>
    %378 = vector.extract_strided_slice %367 {offsets = [0, 5, 0], sizes = [2, 1, 32], strides = [1, 1, 1]} : vector<2x8x32xf32> to vector<2x1x32xf32>
    %379 = vector.shape_cast %378 : vector<2x1x32xf32> to vector<2x32xf32>
    %380 = vector.extract_strided_slice %367 {offsets = [0, 6, 0], sizes = [2, 1, 32], strides = [1, 1, 1]} : vector<2x8x32xf32> to vector<2x1x32xf32>
    %381 = vector.shape_cast %380 : vector<2x1x32xf32> to vector<2x32xf32>
    %382 = vector.extract_strided_slice %367 {offsets = [0, 7, 0], sizes = [2, 1, 32], strides = [1, 1, 1]} : vector<2x8x32xf32> to vector<2x1x32xf32>
    %383 = vector.shape_cast %382 : vector<2x1x32xf32> to vector<2x32xf32>
    %384 = tpu.concatenate %369, %371, %373, %375, %377, %379, %381, %383 in 1 : vector<2x32xf32>, vector<2x32xf32>, vector<2x32xf32>, vector<2x32xf32>, vector<2x32xf32>, vector<2x32xf32>, vector<2x32xf32>, vector<2x32xf32> -> vector<2x256xf32>
    %c0_140 = arith.constant 0 : index
    %c0_141 = arith.constant 0 : index
    %385 = vector.load %arg6[%c0_140, %c0_141] : memref<2x256xf32, #tpu.memory_space<vmem>>, vector<2x256xf32>
    tpu.vector_store %arg6[%c0_140, %c0_141], %384 {strides = array<i32>} : memref<2x256xf32, #tpu.memory_space<vmem>>, vector<2x256xf32>,
    return
  }
  func.func @transform_0(%arg0: i32) -> (i32, i32, i32) {
    %c0_i32 = arith.constant 0 : i32
    %c0_i32_0 = arith.constant 0 : i32
    %c0_i32_1 = arith.constant 0 : i32
    %c0_i32_2 = arith.constant 0 : i32
    return %c0_i32, %c0_i32_0, %c0_i32_1 : i32, i32, i32
  }
  func.func @transform_1(%arg0: i32) -> (i32, i32, i32) {
    %c0_i32 = arith.constant 0 : i32
    %c0_i32_0 = arith.constant 0 : i32
    %c0_i32_1 = arith.constant 0 : i32
    %c0_i32_2 = arith.constant 0 : i32
    return %c0_i32, %c0_i32_0, %c0_i32_1 : i32, i32, i32
  }
  func.func @transform_2(%arg0: i32) -> (i32, i32, i32) {
    %c0_i32 = arith.constant 0 : i32
    %c0_i32_0 = arith.constant 0 : i32
    %c0_i32_1 = arith.constant 0 : i32
    %c0_i32_2 = arith.constant 0 : i32
    return %c0_i32, %c0_i32_0, %c0_i32_1 : i32, i32, i32
  }
  func.func @transform_3(%arg0: i32) -> (i32, i32, i32) {
    %c0_i32 = arith.constant 0 : i32
    %c0_i32_0 = arith.constant 0 : i32
    %c0_i32_1 = arith.constant 0 : i32
    %c0_i32_2 = arith.constant 0 : i32
    return %c0_i32, %c0_i32_0, %c0_i32_1 : i32, i32, i32
  }
  func.func @transform_4(%arg0: i32) -> (i32, i32) {
    %c0_i32 = arith.constant 0 : i32
    %c0_i32_0 = arith.constant 0 : i32
    %c0_i32_1 = arith.constant 0 : i32
    return %c0_i32, %c0_i32_0 : i32, i32
  }
  func.func @transform_5(%arg0: i32) -> (i32, i32) {
    %c0_i32 = arith.constant 0 : i32
    %c0_i32_0 = arith.constant 0 : i32
    %c0_i32_1 = arith.constant 0 : i32
    return %c0_i32, %c0_i32_0 : i32, i32
  }
}

</mosaic_0001>

<bundles_post_ra>
// kernel: tpu_custom_call.1
= control target key start
LH: loop header
LB: loop body
LE: loop exit
PB: predicated region body
PF: predicated region fallthrough
CT: control target
= control target key end

     0   :  { %10 = vsyncpa [#allocation3], 0  ;;  %s4985_s0 = inlined_call_operand.hbm [shape: f32[2,8,32], index: 0, kind: input, shape index: {}]   ;;  %s4986_s1 = inlined_call_operand.vmem [shape: f32[2,1,8], index: 1, kind: input, shape index: {}]   ;;  %s4987_s2 = inlined_call_operand.hbm [shape: bf16[2,160,128], index: 2, kind: input, shape index: {}]   ;;  %s4988_s3 = inlined_call_operand.hbm [shape: f32[2,8,128], index: 3, kind: input, shape index: {}]   ;;  %s4989_s4 = inlined_call_operand.vmem [shape: f32[2,128], index: 4, kind: input, shape index: {}]   ;;  %s4990_s5 = inlined_call_operand.hbm [shape: f32[2,256], index: 5, kind: output, shape index: {}]  }
   0x1   :  { %11 = vsyncpa [#allocation6], 0 }
   0x2   :  { %12 = vsyncpa [#allocation4], 0  ;;  %s4402_s18 = smov [#allocation5]   ;;  %s4308_s22 = scalar_lea.hbm %s4987_s2, 2560 }
   0x3   :  { %s32_s19 = sshll.u32 %s4402_s18, 4  ;;  %p4309_p0 = scmp.ne.s32.totalorder %s4987_s2, %s4308_s22  ;;  %s33_s19 = int_to_ptr.vmem [resolvable:$true] %s32_s19 }
   0x4   :  { %p4312_p1 = scmp.lt.u32.totalorder %s4308_s22, %s4987_s2 }
   0x6   :  { %p4314_p2 = pnand %p4312_p1, %p4309_p0 }
   0x8   :  { %4317 = shalt.err (!%p4314_p2)
}
   0x9   :  { %s4318_s27 = scalar_lea.vmem %s33_s19, 2560  ;;  %p4323_p4 = scmp.lt.s32.totalorder %s33_s19, %s33_s19 }
   0xa   :  { %p4319_p3 = scmp.ne.s32.totalorder %s33_s19, %s4318_s27  ;;  %p4324_p5 = scmp.lt.s32.totalorder %s4318_s27, %s4318_s27 }
   0xc   :  { %p4325_p6 = por %p4324_p5, %p4323_p4 }
   0xe   :  { %p4326_p7 = pnand %p4325_p6, %p4319_p3 }
  0x10   :  { %4329 = shalt.err (!%p4326_p7)
}
  0x11   :  { %s4403_s28 = smov 64   ;;  %s4404_s29 = smov 4  }
  0x12   :  { %38 = dma.hbm_to_vmem [thread:$0]  %s4987_s2, 2560, %s33_s19, [#allocation6], %s4403_s28, %s4403_s28, %s4404_s29  }
  0x13   :  { %s4405_s7 = smov [#allocation2]   ;;  %s4330_s11 = scalar_lea.hbm %s4985_s0, 256 }
  0x14   :  { %s18_s8 = sshll.u32 %s4405_s7, 4  ;;  %p4331_p8 = scmp.ne.s32.totalorder %s4985_s0, %s4330_s11  ;;  %s19_s8 = int_to_ptr.vmem [resolvable:$true] %s18_s8 }
  0x15   :  { %p4334_p9 = scmp.lt.u32.totalorder %s4330_s11, %s4985_s0 }
  0x17   :  { %p4336_p10 = pnand %p4334_p9, %p4331_p8 }
  0x19   :  { %4339 = shalt.err (!%p4336_p10)
}
  0x1a   :  { %s4340_s16 = scalar_lea.vmem %s19_s8, 256  ;;  %p4345_p12 = scmp.lt.s32.totalorder %s19_s8, %s19_s8 }
  0x1b   :  { %p4341_p11 = scmp.ne.s32.totalorder %s19_s8, %s4340_s16  ;;  %p4346_p13 = scmp.lt.s32.totalorder %s4340_s16, %s4340_s16 }
  0x1d   :  { %p4347_p0 = por %p4346_p13, %p4345_p12 }
  0x1f   :  { %p4348_p1 = pnand %p4347_p0, %p4341_p11 }
  0x21   :  { %4351 = shalt.err (!%p4348_p1)
}
  0x22   :  { %s4406_s2 = smov 128   ;;  %s4407_s17 = smov 8  }
  0x23   :  { %24 = dma.hbm_to_vmem [thread:$0]  %s4985_s0, 256, %s19_s8, [#allocation3], %s4406_s2, %s4406_s2, %s4407_s17  }
  0x24   :  { %s4408_s20 = smov [#allocation7]   ;;  %s4352_s24 = scalar_lea.hbm %s4988_s3, 256 }
  0x25   :  { %s44_s21 = sshll.u32 %s4408_s20, 4  ;;  %p4353_p2 = scmp.ne.s32.totalorder %s4988_s3, %s4352_s24  ;;  %s45_s21 = int_to_ptr.vmem [resolvable:$true] %s44_s21 }
  0x26   :  { %p4356_p3 = scmp.lt.u32.totalorder %s4352_s24, %s4988_s3 }
  0x28   :  { %p4358_p4 = pnand %p4356_p3, %p4353_p2 }
  0x2a   :  { %4361 = shalt.err (!%p4358_p4)
}
  0x2b   :  { %s4362_s30 = scalar_lea.vmem %s45_s21, 256  ;;  %p4367_p6 = scmp.lt.s32.totalorder %s45_s21, %s45_s21 }
  0x2c   :  { %p4363_p5 = scmp.ne.s32.totalorder %s45_s21, %s4362_s30  ;;  %p4368_p7 = scmp.lt.s32.totalorder %s4362_s30, %s4362_s30 }
  0x2e   :  { %p4369_p8 = por %p4368_p7, %p4367_p6 }
  0x30   :  { %p4370_p9 = pnand %p4369_p8, %p4363_p5 }
  0x32   :  { %4373 = shalt.err (!%p4370_p9)
}
  0x33   :  { %50 = dma.hbm_to_vmem [thread:$0]  %s4988_s3, 256, %s45_s21, [#allocation6], %s4406_s2, %s4406_s2, %s4407_s17  }
  0x34   :  { %4396 = dma.done.wait [#allocation3], 256  }
  0x35   :  { %4397 = vsyncadd [#allocation3], 4294967040 }
  0x36   :  { %4398 = dma.done.wait [#allocation6], 2816  }
  0x37   :  { %4399 = vsyncadd [#allocation6], 4294964480  ;;  %vm111_vm0 = vcmask 261120   ;;  %v4495_v0 = vld [vmem:[#allocation2] sm:$0xff]  ;;  %v4497_v1 = vld [vmem:[#allocation2 + $0x8] sm:$0xff]  ;;  %v4409_v15 = vmov 0.0   ;;  %v73_v53 = vlaneseq }
  0x38   :  { %v112_v2 = vsel %vm111_vm0, %v4495_v0, 0.0  ;;  %v115_v3 = vsel %vm111_vm0, %v4497_v1, 0.0  ;;  %v4184_v14 = vld [vmem:[#allocation5] sm:$0xff]   ;;  %3899 = vmatprep.subr.bf16.mxu0 %v4409_v15  ;;  %vm4410_vm1 = vmmov 0   ;;  %v4185_v16 = vld [vmem:[#allocation5 + $0x8] sm:$0xff]   ;;  %3912 = vmatprep.subr.mxu1 %v4409_v15  ;;  %s4411_s3 = smov 96  }
  0x39   :  { %113 = vadd.xlane.f32.xlu0 %v112_v2  ;;  %3903 = vmatprep.mubr.msk.bf16.mxu0 %vm4410_vm1, %v4409_v15  ;;  %v3712_v33 = vld [vmem:[#allocation7 + $0x4] ss:$0 sm:$0xff]  ;;  %v3713_v39 = vld [vmem:[#allocation7 + $0x5] ss:$0 sm:$0xff]  ;;  %v3714_v44 = vld [vmem:[#allocation7] ss:$0 sm:$0xff] }
  0x3a   :  { %3900 = vmatpush3.bf16.msra.mxu0 %v4184_v14  ;;  %3914 = vmatprep.mubr.msk.f32.mxu1 %vm4410_vm1, %v4409_v15  ;;  %vm228_vm6 = vcmask 64512   ;;  %v65_v54 = vld [vmem:[%s4986_s1] sm:$0x1]  ;;  %v74_v55 = vshrl.u32 %v73_v53, 7  ;;  %v66_v56 = vld [vmem:[%s4986_s1 + $0x1] sm:$0x1] }
  0x3b   :  { %3901 = vmatprep.subr.bf16.mxu0 %v4409_v15  ;;  %vm67_vm7 = vcmp.eq.f32.partialorder %v65_v54, 0.0  ;;  %vm68_vm8 = vcmp.eq.f32.partialorder %v66_v56, 0.0  ;;  %s4412_s1 = smov 88   ;;  %s4413_s11 = smov 120   ;;  %vm1570_vm9 = vcmask 130048   ;;  %vm1573_vm10 = vcmask 195584  }
  0x3c   :  { %v75_v57 = vsub.s32 0, %v74_v55  ;;  %v69_v58 = vsel %vm67_vm7, -1e+09, %v4409_v15  ;;  %v70_v59 = vsel %vm68_vm8, -1e+09, %v4409_v15  ;;  %s4414_s12 = smov 56  }
  0x3d   :  { %116 = vadd.xlane.f32.xlu0 %v115_v3  ;;  %s4415_s13 = smov 80   ;;  %s4416_s14 = smov 112   ;;  %vm1779_vm15 = vcmask 523264  }
  0x3e   :  { %3902 = vmatpush3.bf16.msra.mxu0 %v4185_v16  ;;  %v4546_v60 = vrot.slane %v69_v58, %v75_v57  ;;  %v4548_v61 = vrot.slane %v70_v59, %v75_v57  ;;  %s4417_s15 = smov 48   ;;  %s4418_s16 = smov 72  }
  0x3f   :  { %3907 = vmatprep.subr.mxu0 %v4409_v15  ;;  %s4419_s2 = smov 104   ;;  %s4420_s18 = smov 40  }
  0x40   :  { %s4421_s19 = smov 16   ;;  %s4422_s20 = smov 24  }
  0x41   :  { %s4424_s24 = smov [#allocation8]  }
  0x42   :  { %s3702_s25 = sshll.u32 %s4424_s24, 4  ;;  %s3703_s25 = int_to_ptr.vmem [resolvable:$true] %s3702_s25 }
  0x43   :  { %p4379_p11 = scmp.lt.s32.totalorder %s3703_s25, %s3703_s25 }
  0xc6   :  { %v114_v4 = vpop.xlane.xlu0 %113 }
  0xc7   :  { %v118_v5 = vmul.f32 0.03125, %v114_v4 }
  0xc9   :  { %v120_v6 = vsub.f32 %v4495_v0, %v118_v5 }
  0xca   :  { %v117_v7 = vpop.xlane.xlu0 %116 }
  0xcb   :  { %v119_v8 = vmul.f32 0.03125, %v117_v7  ;;  %v122_v9 = vmul.f32 %v120_v6, %v120_v6  ;;  %v154_v35 = vmul.f32 %v3712_v33, %v120_v6 }
  0xcd   :  { %v121_v10 = vsub.f32 %v4497_v1, %v119_v8  ;;  %v124_v11 = vsel %vm111_vm0, %v122_v9, 0.0 }
  0xce   :  { %125 = vadd.xlane.f32.xlu1 %v124_v11 }
  0xcf   :  { %v123_v12 = vmul.f32 %v121_v10, %v121_v10  ;;  %v155_v36 = vmul.f32 %v3712_v33, %v121_v10 }
  0xd1   :  { %v127_v13 = vsel %vm111_vm0, %v123_v12, 0.0 }
  0xd2   :  { %128 = vadd.xlane.f32.xlu1 %v127_v13 }
 0x15b   :  { %v126_v17 = vpop.xlane.xlu1 %125 }
 0x15c   :  { %v130_v18 = vmul.f32 0.032258064, %v126_v17 }
 0x15e   :  { %4204 = vrsqrt.f32 %v130_v18  ;;  %vm134_vm2 = vcmp.eq.f32.partialorder %v130_v18, inf  ;;  %v137_v23 = vand.u32 2147483648, %v130_v18  ;;  %vm136_vm3 = vcmp.eq.f32.partialorder %v130_v18, 0.0 }
 0x15f   :  { %v129_v19 = vpop.xlane.xlu1 %128 }
 0x160   :  { %v131_v20 = vmul.f32 0.032258064, %v129_v19 }
 0x162   :  { %4206 = vrsqrt.f32 %v131_v20  ;;  %vm141_vm4 = vcmp.eq.f32.partialorder %v131_v20, inf  ;;  %v144_v29 = vand.u32 2147483648, %v131_v20  ;;  %vm143_vm5 = vcmp.eq.f32.partialorder %v131_v20, 0.0 }
 0x168   :  { %v4205_v21 = vpop.eup %4204 }
 0x169   :  { %v133_v22 = vmul.f32 %v4205_v21, %v130_v18 }
 0x16b   :  { %v135_v24 = vsel %vm134_vm2, %v130_v18, %v133_v22 }
 0x16c   :  { %v4207_v25 = vpop.eup %4206  ;;  %v138_v26 = vsel %vm136_vm3, %v137_v23, %v135_v24 }
 0x16d   :  { %v146_v27 = vadd.f32 1e-06, %v138_v26  ;;  %v140_v28 = vmul.f32 %v4207_v25, %v131_v20 }
 0x16f   :  { %v142_v30 = vsel %vm141_vm4, %v131_v20, %v140_v28  ;;  %4208 = vrcp.f32 %v146_v27 }
 0x170   :  { %v145_v31 = vsel %vm143_vm5, %v144_v29, %v142_v30 }
 0x171   :  { %v147_v32 = vadd.f32 1e-06, %v145_v31 }
 0x173   :  { %4210 = vrcp.f32 %v147_v32 }
 0x179   :  { %v4209_v34 = vpop.eup %4208 }
 0x17a   :  { %v156_v37 = vmul.f32 %v4209_v34, %v154_v35 }
 0x17c   :  { %v162_v41 = vadd.f32 %v3713_v39, %v156_v37 }
 0x17d   :  { %v4211_v38 = vpop.eup %4210 }
 0x17e   :  { %v157_v40 = vmul.f32 %v4211_v38, %v155_v36 }
 0x180   :  { %v163_v42 = vadd.f32 %v3713_v39, %v157_v40 }
 0x182   :  { %v164_v43 = vpack.c.bf16 %v163_v42, %v162_v41 }
 0x184   :  { %3904 = vmatmul.mubr.msk.bf16.vlgmr.msra.gmra.mrb[0].mxu0 %vm111_vm0, %v164_v43 }
 0x185   :  { %3909 = vmatprep.mubr.msk.f32.mxu0 %vm4410_vm1, %v4409_v15 }
 0x257   :  { %v218_v45 = vpop.f32.mrb[0].mxu0 }
 0x258   :  { %v4518_v46 = vadd.f32 %v3714_v44, %v218_v45  ;;  %v3905_v47 = vpop.f32.mrb[1].mxu0 }
 0x259   :  { %v221_v48 = vpop.f32.mrb[2].mxu0 }
 0x25a   :  { %v4520_v49 = vadd.f32 %v3714_v44, %v221_v48  ;;  %226 = vrot.lane.b32.xlu0 %v4518_v46, %s4411_s3  ;;  %v3906_v50 = vpop.f32.mrb[3].mxu0 }
 0x25c   :  { %304 = vrot.lane.b32.xlu1 %v4520_v49, %s4411_s3 }
 0x2cc   :  { %v227_v51 = vpop.permute.xlu0 %226 }
 0x2cd   :  { %3908 = vmatpush3.xpose.msk.msra.mxu0 %vm228_vm6, %v227_v51 }
 0x2ce   :  { %v305_v52 = vpop.permute.xlu1 %304  ;;  %3922 = vmatprep.subr.mxu0 %v4409_v15 }
 0x2cf   :  { %3913 = vmatpush3.xpose.msk.msra.mxu1 %vm228_vm6, %v305_v52 }
 0x2d0   :  { %3910 = vmatmul.mubr.msk.f32.vlgmr.msra.gmra.mrb[4].mxu0 %vm228_vm6, %v4518_v46  ;;  %3917 = vmatprep.subr.mxu1 %v4409_v15 }
 0x2d1   :  { %3924 = vmatprep.mubr.msk.f32.mxu0 %vm4410_vm1, %v4409_v15 }
 0x2d2   :  { %3915 = vmatmul.mubr.msk.f32.vlgmr.msra.gmra.mrb[0].mxu1 %vm228_vm6, %v4520_v49 }
 0x2d3   :  { %3919 = vmatprep.mubr.msk.f32.mxu1 %vm4410_vm1, %v4409_v15 }
 0x3a3   :  { %v299_v62 = vpop.f32.mrb[4].mxu0 }
 0x3a4   :  { %v300_v63 = vadd.f32 %v299_v62, %v4546_v60  ;;  %v3911_v2 = vpop.f32.mrb[5].mxu0 }
 0x3a5   :  { %v376_v3 = vpop.f32.mrb[0].mxu1 }
 0x3a6   :  { %v377_v4 = vadd.f32 %v376_v3, %v4548_v61  ;;  %v3916_v5 = vpop.f32.mrb[1].mxu1  ;;  %v380_v6 = vsel %vm228_vm6, %v300_v63, -inf }
 0x3a7   :  { %381 = vmax.xlane.f32.xlu1 %v380_v6 }
 0x3a8   :  { %v383_v7 = vsel %vm228_vm6, %v377_v4, -inf }
 0x3a9   :  { %384 = vmax.xlane.f32.xlu0 %v383_v7 }
 0x3b8   :  { %478 = vrot.lane.b32.xlu1 %v4520_v49, %s4403_s28 }
 0x3bc   :  { %556 = vrot.lane.b32.xlu1 %v4518_v46, %s4412_s1 }
 0x3bf   :  { %402 = vrot.lane.b32.xlu0 %v4518_v46, %s4403_s28 }
 0x3c0   :  { %634 = vrot.lane.b32.xlu1 %v4520_v49, %s4412_s1 }
 0x434   :  { %v382_v8 = vpop.xlane.xlu1 %381 }
 0x435   :  { %v386_v9 = vsub.f32 %v300_v63, %v382_v8 }
 0x436   :  { %v385_v10 = vpop.xlane.xlu0 %384 }
 0x437   :  { %v388_v11 = vmul.f32 1.442695, %v386_v9  ;;  %v387_v12 = vsub.f32 %v377_v4, %v385_v10 }
 0x438   :  { %v479_v13 = vpop.permute.xlu1 %478 }
 0x439   :  { %4212 = vpow2.f32 %v388_v11  ;;  %v390_v14 = vmul.f32 1.442695, %v387_v12  ;;  %3923 = vmatpush3.msra.mxu0 %v479_v13 }
 0x43a   :  { %v403_v16 = vpop.permute.xlu0 %402  ;;  %3932 = vmatprep.subr.mxu0 %v4409_v15 }
 0x43b   :  { %4214 = vpow2.f32 %v390_v14  ;;  %3918 = vmatpush3.msra.mxu1 %v403_v16 }
 0x43c   :  { %3927 = vmatprep.subr.mxu1 %v4409_v15  ;;  %v557_v21 = vpop.permute.xlu1 %556 }
 0x440   :  { %v635_v22 = vpop.permute.xlu1 %634 }
 0x443   :  { %v4213_v17 = vpop.eup %4212 }
 0x444   :  { %v392_v18 = vsel %vm228_vm6, %v4213_v17, 0.0 }
 0x445   :  { %v4215_v19 = vpop.eup %4214  ;;  %393 = vadd.xlane.f32.xlu0 %v392_v18 }
 0x446   :  { %v395_v20 = vsel %vm228_vm6, %v4215_v19, 0.0 }
 0x447   :  { %396 = vadd.xlane.f32.xlu1 %v395_v20 }
 0x458   :  { %632 = vrot.lane.b32.xlu1 %v4520_v49, %s4413_s11 }
 0x45b   :  { %554 = vrot.lane.b32.xlu0 %v4518_v46, %s4413_s11 }
 0x4d2   :  { %v394_v23 = vpop.xlane.xlu0 %393 }
 0x4d3   :  { %4216 = vrcp.f32 %v394_v23 }
 0x4d4   :  { %v397_v24 = vpop.xlane.xlu1 %396 }
 0x4d5   :  { %4218 = vrcp.f32 %v397_v24 }
 0x4d6   :  { %v555_v29 = vpop.permute.xlu0 %554 }
 0x4d8   :  { %v633_v30 = vpop.permute.xlu1 %632 }
 0x4dd   :  { %v4217_v25 = vpop.eup %4216 }
 0x4de   :  { %v400_v26 = vmul.f32 %v4217_v25, %v4213_v17 }
 0x4df   :  { %v4219_v27 = vpop.eup %4218 }
 0x4e0   :  { %v401_v28 = vmul.f32 %v4219_v27, %v4215_v19  ;;  %3920 = vmatmul.mubr.msk.f32.vlgmr.msra.gmra.mrb[2].mxu1 %vm228_vm6, %v400_v26 }
 0x4e1   :  { %3928 = vmatpush3.xpose.msk.msra.mxu1 %vm228_vm6, %v557_v21  ;;  %3929 = vmatprep.mubr.msk.f32.mxu1 %vm4410_vm1, %v4409_v15 }
 0x4e2   :  { %3925 = vmatmul.mubr.msk.f32.vlgmr.msra.gmra.mrb[6].mxu0 %vm228_vm6, %v401_v28  ;;  %3937 = vmatprep.subr.mxu1 %v4409_v15 }
 0x4e3   :  { %3933 = vmatpush3.xpose.msk.msra.mxu0 %vm228_vm6, %v635_v22  ;;  %3934 = vmatprep.mubr.msk.f32.mxu0 %vm4410_vm1, %v4409_v15 }
 0x4e4   :  { %3930 = vmatmul.mubr.msk.f32.vlgmr.msra.gmra.mrb[4].mxu1 %vm228_vm6, %v555_v29  ;;  %3942 = vmatprep.subr.mxu0 %v4409_v15 }
 0x4e5   :  { %3939 = vmatprep.mubr.msk.f32.mxu1 %vm4410_vm1, %v4409_v15 }
 0x4e6   :  { %3935 = vmatmul.mubr.msk.f32.vlgmr.msra.gmra.mrb[8].mxu0 %vm228_vm6, %v633_v30 }
 0x4e7   :  { %3944 = vmatprep.mubr.msk.f32.mxu0 %vm4410_vm1, %v4409_v15 }
 0x5b3   :  { %v4586_v31 = vpop.f32.mrb[2].mxu1 }
 0x5b4   :  { %v3921_v32 = vpop.f32.mrb[3].mxu1 }
 0x5b5   :  { %v4588_v33 = vpop.f32.mrb[6].mxu0 }
 0x5b6   :  { %v3926_v34 = vpop.f32.mrb[7].mxu0 }
 0x5b7   :  { %v628_v35 = vpop.f32.mrb[4].mxu1 }
 0x5b8   :  { %v629_v36 = vadd.f32 %v628_v35, %v4546_v60  ;;  %v3931_v37 = vpop.f32.mrb[5].mxu1 }
 0x5b9   :  { %v706_v38 = vpop.f32.mrb[8].mxu0 }
 0x5ba   :  { %v707_v39 = vadd.f32 %v706_v38, %v4548_v61  ;;  %v3936_v40 = vpop.f32.mrb[9].mxu0  ;;  %v710_v41 = vsel %vm228_vm6, %v629_v36, -inf }
 0x5bb   :  { %711 = vmax.xlane.f32.xlu0 %v710_v41 }
 0x5bc   :  { %v713_v42 = vsel %vm228_vm6, %v707_v39, -inf }
 0x5bd   :  { %714 = vmax.xlane.f32.xlu1 %v713_v42 }
 0x5ce   :  { %808 = vrot.lane.b32.xlu1 %v4520_v49, %s4414_s12 }
 0x5d1   :  { %732 = vrot.lane.b32.xlu0 %v4518_v46, %s4414_s12 }
 0x5d2   :  { %886 = vrot.lane.b32.xlu1 %v4518_v46, %s4415_s13 }
 0x5d6   :  { %964 = vrot.lane.b32.xlu1 %v4520_v49, %s4415_s13 }
 0x5da   :  { %962 = vrot.lane.b32.xlu1 %v4520_v49, %s4416_s14 }
 0x648   :  { %v712_v43 = vpop.xlane.xlu0 %711 }
 0x649   :  { %v716_v44 = vsub.f32 %v629_v36, %v712_v43 }
 0x64a   :  { %v715_v45 = vpop.xlane.xlu1 %714 }
 0x64b   :  { %v718_v47 = vmul.f32 1.442695, %v716_v44  ;;  %v717_v48 = vsub.f32 %v707_v39, %v715_v45 }
 0x64c   :  { %v733_v50 = vpop.permute.xlu0 %732 }
 0x64d   :  { %4220 = vpow2.f32 %v718_v47  ;;  %v720_v51 = vmul.f32 1.442695, %v717_v48  ;;  %3938 = vmatpush3.msra.mxu1 %v733_v50 }
 0x64e   :  { %v809_v52 = vpop.permute.xlu1 %808  ;;  %3947 = vmatprep.subr.mxu1 %v4409_v15 }
 0x64f   :  { %4222 = vpow2.f32 %v720_v51  ;;  %3943 = vmatpush3.msra.mxu0 %v809_v52 }
 0x650   :  { %3952 = vmatprep.subr.mxu0 %v4409_v15 }
 0x652   :  { %v887_v59 = vpop.permute.xlu1 %886 }
 0x656   :  { %v965_v3 = vpop.permute.xlu1 %964 }
 0x657   :  { %v4221_v53 = vpop.eup %4220 }
 0x658   :  { %v722_v54 = vsel %vm228_vm6, %v4221_v53, 0.0 }
 0x659   :  { %v4223_v55 = vpop.eup %4222  ;;  %723 = vadd.xlane.f32.xlu0 %v722_v54 }
 0x65a   :  { %v725_v56 = vsel %vm228_vm6, %v4223_v55, 0.0  ;;  %v963_v6 = vpop.permute.xlu1 %962 }
 0x65d   :  { %726 = vadd.xlane.f32.xlu0 %v725_v56 }
 0x673   :  { %884 = vrot.lane.b32.xlu0 %v4518_v46, %s4416_s14 }
 0x6e6   :  { %v724_v57 = vpop.xlane.xlu0 %723 }
 0x6e7   :  { %4224 = vrcp.f32 %v724_v57 }
 0x6ea   :  { %v727_v58 = vpop.xlane.xlu0 %726 }
 0x6eb   :  { %4226 = vrcp.f32 %v727_v58 }
 0x6ee   :  { %v885_v5 = vpop.permute.xlu0 %884 }
 0x6f1   :  { %v4225_v62 = vpop.eup %4224 }
 0x6f2   :  { %v730_v63 = vmul.f32 %v4225_v62, %v4221_v53 }
 0x6f4   :  { %3940 = vmatmul.mubr.msk.f32.vlgmr.msra.gmra.mrb[6].mxu1 %vm228_vm6, %v730_v63 }
 0x6f5   :  { %v4227_v2 = vpop.eup %4226  ;;  %3948 = vmatpush3.xpose.msk.msra.mxu1 %vm228_vm6, %v887_v59  ;;  %3949 = vmatprep.mubr.msk.f32.mxu1 %vm4410_vm1, %v4409_v15 }
 0x6f6   :  { %v731_v4 = vmul.f32 %v4227_v2, %v4223_v55  ;;  %3957 = vmatprep.subr.mxu1 %v4409_v15 }
 0x6f8   :  { %3945 = vmatmul.mubr.msk.f32.vlgmr.msra.gmra.mrb[10].mxu0 %vm228_vm6, %v731_v4  ;;  %3950 = vmatmul.mubr.msk.f32.vlgmr.msra.gmra.mrb[8].mxu1 %vm228_vm6, %v885_v5 }
 0x6f9   :  { %3953 = vmatpush3.xpose.msk.msra.mxu0 %vm228_vm6, %v965_v3  ;;  %3954 = vmatprep.mubr.msk.f32.mxu0 %vm4410_vm1, %v4409_v15 }
 0x6fa   :  { %3962 = vmatprep.subr.mxu0 %v4409_v15  ;;  %3959 = vmatprep.mubr.msk.f32.mxu1 %vm4410_vm1, %v4409_v15 }
 0x6fc   :  { %3955 = vmatmul.mubr.msk.f32.vlgmr.msra.gmra.mrb[12].mxu0 %vm228_vm6, %v963_v6 }
 0x6fd   :  { %3964 = vmatprep.mubr.msk.f32.mxu0 %vm4410_vm1, %v4409_v15 }
 0x7c7   :  { %v4626_v7 = vpop.f32.mrb[6].mxu1 }
 0x7c8   :  { %v3941_v8 = vpop.f32.mrb[7].mxu1 }
 0x7cb   :  { %v4628_v9 = vpop.f32.mrb[10].mxu0  ;;  %v958_v10 = vpop.f32.mrb[8].mxu1 }
 0x7cc   :  { %v4154_v11 = vpack.i.bf16 %v4628_v9, %v4626_v7  ;;  %v959_v12 = vadd.f32 %v958_v10, %v4546_v60  ;;  %v3946_v13 = vpop.f32.mrb[11].mxu0  ;;  %v3951_v14 = vpop.f32.mrb[9].mxu1 }
 0x7ce   :  { %v1040_v16 = vsel %vm228_vm6, %v959_v12, -inf }
 0x7cf   :  { %1041 = vmax.xlane.f32.xlu0 %v1040_v16  ;;  %v1036_v17 = vpop.f32.mrb[12].mxu0 }
 0x7d0   :  { %v1037_v18 = vadd.f32 %v1036_v17, %v4548_v61  ;;  %v3956_v19 = vpop.f32.mrb[13].mxu0 }
 0x7d2   :  { %v1043_v20 = vsel %vm228_vm6, %v1037_v18, -inf }
 0x7d3   :  { %1044 = vmax.xlane.f32.xlu1 %v1043_v20 }
 0x7e4   :  { %1138 = vrot.lane.b32.xlu1 %v4520_v49, %s4417_s15 }
 0x7e5   :  { %1062 = vrot.lane.b32.xlu0 %v4518_v46, %s4417_s15 }
 0x7e8   :  { %1216 = vrot.lane.b32.xlu1 %v4518_v46, %s4418_s16 }
 0x7ec   :  { %1294 = vrot.lane.b32.xlu1 %v4520_v49, %s4418_s16 }
 0x7f0   :  { %1292 = vrot.lane.b32.xlu1 %v4520_v49, %s4419_s2 }
 0x85c   :  { %v1042_v21 = vpop.xlane.xlu0 %1041 }
 0x85d   :  { %v1046_v22 = vsub.f32 %v959_v12, %v1042_v21 }
 0x85f   :  { %v1048_v23 = vmul.f32 1.442695, %v1046_v22 }
 0x860   :  { %v1063_v24 = vpop.permute.xlu0 %1062  ;;  %v1045_v25 = vpop.xlane.xlu1 %1044 }
 0x861   :  { %4228 = vpow2.f32 %v1048_v23  ;;  %v1047_v26 = vsub.f32 %v1037_v18, %v1045_v25  ;;  %3958 = vmatpush3.msra.mxu1 %v1063_v24  ;;  %v4187_v18 = vld [vmem:[#allocation5 + $0x18] sm:$0xff]  }
 0x862   :  { %3967 = vmatprep.subr.mxu1 %v4409_v15 }
 0x863   :  { %v1050_v27 = vmul.f32 1.442695, %v1047_v26 }
 0x864   :  { %v1139_v28 = vpop.permute.xlu1 %1138 }
 0x865   :  { %4230 = vpow2.f32 %v1050_v27  ;;  %3963 = vmatpush3.msra.mxu0 %v1139_v28 }
 0x866   :  { %3972 = vmatprep.subr.mxu0 %v4409_v15 }
 0x868   :  { %v1217_v37 = vpop.permute.xlu1 %1216 }
 0x86b   :  { %v4229_v29 = vpop.eup %4228 }
 0x86c   :  { %v1052_v30 = vsel %vm228_vm6, %v4229_v29, 0.0  ;;  %v1295_v41 = vpop.permute.xlu1 %1294 }
 0x86d   :  { %1053 = vadd.xlane.f32.xlu0 %v1052_v30 }
 0x86f   :  { %v4231_v32 = vpop.eup %4230 }
 0x870   :  { %v1055_v34 = vsel %vm228_vm6, %v4231_v32, 0.0  ;;  %v1293_v44 = vpop.permute.xlu1 %1292 }
 0x871   :  { %1056 = vadd.xlane.f32.xlu0 %v1055_v34 }
 0x887   :  { %1214 = vrot.lane.b32.xlu0 %v4518_v46, %s4419_s2 }
 0x8fa   :  { %v1054_v35 = vpop.xlane.xlu0 %1053 }
 0x8fb   :  { %4232 = vrcp.f32 %v1054_v35 }
 0x8fe   :  { %v1057_v36 = vpop.xlane.xlu0 %1056 }
 0x8ff   :  { %4234 = vrcp.f32 %v1057_v36 }
 0x902   :  { %v1215_v43 = vpop.permute.xlu0 %1214 }
 0x905   :  { %v4233_v38 = vpop.eup %4232 }
 0x906   :  { %v1060_v39 = vmul.f32 %v4233_v38, %v4229_v29 }
 0x908   :  { %3960 = vmatmul.mubr.msk.f32.vlgmr.msra.gmra.mrb[10].mxu1 %vm228_vm6, %v1060_v39 }
 0x909   :  { %v4235_v40 = vpop.eup %4234  ;;  %3968 = vmatpush3.xpose.msk.msra.mxu1 %vm228_vm6, %v1217_v37  ;;  %3969 = vmatprep.mubr.msk.f32.mxu1 %vm4410_vm1, %v4409_v15 }
 0x90a   :  { %v1061_v42 = vmul.f32 %v4235_v40, %v4231_v32  ;;  %3977 = vmatprep.subr.mxu1 %v4409_v15 }
 0x90c   :  { %3965 = vmatmul.mubr.msk.f32.vlgmr.msra.gmra.mrb[14].mxu0 %vm228_vm6, %v1061_v42  ;;  %3970 = vmatmul.mubr.msk.f32.vlgmr.msra.gmra.mrb[12].mxu1 %vm228_vm6, %v1215_v43 }
 0x90d   :  { %3973 = vmatpush3.xpose.msk.msra.mxu0 %vm228_vm6, %v1295_v41  ;;  %3974 = vmatprep.mubr.msk.f32.mxu0 %vm4410_vm1, %v4409_v15 }
 0x90e   :  { %3982 = vmatprep.subr.mxu0 %v4409_v15  ;;  %3979 = vmatprep.mubr.msk.f32.mxu1 %vm4410_vm1, %v4409_v15 }
 0x910   :  { %3975 = vmatmul.mubr.msk.f32.vlgmr.msra.gmra.mrb[16].mxu0 %vm228_vm6, %v1293_v44 }
 0x911   :  { %3984 = vmatprep.mubr.msk.f32.mxu0 %vm4410_vm1, %v4409_v15 }
 0x9db   :  { %v1134_v45 = vpop.f32.mrb[10].mxu1 }
 0x9dc   :  { %v3961_v47 = vpop.f32.mrb[11].mxu1 }
 0x9df   :  { %v1210_v48 = vpop.f32.mrb[14].mxu0  ;;  %v1288_v50 = vpop.f32.mrb[12].mxu1 }
 0x9e0   :  { %v4159_v51 = vpack.i.bf16 %v1210_v48, %v1134_v45  ;;  %v1289_v52 = vadd.f32 %v1288_v50, %v4546_v60  ;;  %v3966_v53 = vpop.f32.mrb[15].mxu0  ;;  %v3971_v54 = vpop.f32.mrb[13].mxu1 }
 0x9e2   :  { %v1370_v55 = vsel %vm228_vm6, %v1289_v52, -inf }
 0x9e3   :  { %1371 = vmax.xlane.f32.xlu0 %v1370_v55  ;;  %v1366_v56 = vpop.f32.mrb[16].mxu0 }
 0x9e4   :  { %v1367_v57 = vadd.f32 %v1366_v56, %v4548_v61  ;;  %v3976_v58 = vpop.f32.mrb[17].mxu0 }
 0x9e6   :  { %v1373_v59 = vsel %vm228_vm6, %v1367_v57, -inf }
 0x9e7   :  { %1374 = vmax.xlane.f32.xlu1 %v1373_v59 }
 0x9f8   :  { %1468 = vrot.lane.b32.xlu1 %v4520_v49, %s4420_s18 }
 0x9fc   :  { %4155 = vrot.lane.b32.xlu1 %v4154_v11, %s4407_s17 }
 0xa00   :  { %4160 = vrot.lane.b32.xlu1 %v4159_v51, %s4421_s19 }
 0xa70   :  { %v1372_v62 = vpop.xlane.xlu0 %1371 }
 0xa71   :  { %v1376_v63 = vsub.f32 %v1289_v52, %v1372_v62 }
 0xa73   :  { %v1378_v2 = vmul.f32 1.442695, %v1376_v63  ;;  %v4188_v63 = vld [vmem:[#allocation5 + $0x20] sm:$0xff]  }
 0xa74   :  { %v1375_v3 = vpop.xlane.xlu1 %1374 }
 0xa75   :  { %4236 = vpow2.f32 %v1378_v2  ;;  %v1377_v4 = vsub.f32 %v1367_v57, %v1375_v3  ;;  %v4189_v2 = vld [vmem:[#allocation5 + $0x28] sm:$0xff]   ;;  %v4190_v3 = vld [vmem:[#allocation5 + $0x30] sm:$0xff]  }
 0xa77   :  { %v1380_v5 = vmul.f32 1.442695, %v1377_v4  ;;  %v4191_v4 = vld [vmem:[#allocation5 + $0x38] sm:$0xff]  }
 0xa78   :  { %v1469_v6 = vpop.permute.xlu1 %1468 }
 0xa79   :  { %4238 = vpow2.f32 %v1380_v5  ;;  %3983 = vmatpush3.msra.mxu0 %v1469_v6 }
 0xa7a   :  { %3995 = vmatprep.subr.bf16.mxu0 %v4409_v15 }
 0xa7c   :  { %v4156_v24 = vpop.permute.xlu1 %4155 }
 0xa7d   :  { %v4158_v26 = vunpack.i.h.bf16 %v4156_v24  ;;  %v4157_v27 = vunpack.i.l.bf16 %v4156_v24 }
 0xa7f   :  { %v4237_v49 = vpop.eup %4236  ;;  %v1569_v32 = vsel %vm228_vm6, %v4588_v33, %v4158_v26  ;;  %v1568_v34 = vsel %vm228_vm6, %v4586_v31, %v4157_v27  ;;  %v3742_v33 = vld [vmem:[#allocation7 + $0x1] ss:$0 sm:$0xff]  ;;  %v3747_v26 = vld [vmem:[#allocation7 + $0x7] ss:$0 sm:$0xff] }
 0xa80   :  { %v1382_v8 = vsel %vm228_vm6, %v4237_v49, 0.0  ;;  %v4161_v25 = vpop.permute.xlu1 %4160 }
 0xa81   :  { %1383 = vadd.xlane.f32.xlu0 %v1382_v8  ;;  %v4163_v28 = vunpack.i.h.bf16 %v4161_v25  ;;  %v4162_v29 = vunpack.i.l.bf16 %v4161_v25 }
 0xa83   :  { %v4239_v7 = vpop.eup %4238  ;;  %v1571_v37 = vsel %vm1570_vm9, %v1568_v34, %v4162_v29  ;;  %v1572_v38 = vsel %vm1570_vm9, %v1569_v32, %v4163_v28  ;;  %v4192_v32 = vld [vmem:[#allocation5 + $0x40] sm:$0xff]   ;;  %v4193_v34 = vld [vmem:[#allocation5 + $0x48] sm:$0xff]  }
 0xa84   :  { %v1385_v9 = vsel %vm228_vm6, %v4239_v7, 0.0 }
 0xa85   :  { %1386 = vadd.xlane.f32.xlu0 %v1385_v9 }
 0xa9b   :  { %1392 = vrot.lane.b32.xlu0 %v4518_v46, %s4420_s18  ;;  %v4186_v46 = vld [vmem:[#allocation5 + $0x10] sm:$0xff]  }
 0xb0e   :  { %v1384_v10 = vpop.xlane.xlu0 %1383 }
 0xb0f   :  { %4240 = vrcp.f32 %v1384_v10 }
 0xb12   :  { %v1387_v11 = vpop.xlane.xlu0 %1386 }
 0xb13   :  { %4242 = vrcp.f32 %v1387_v11 }
 0xb16   :  { %v1393_v12 = vpop.permute.xlu0 %1392 }
 0xb17   :  { %3978 = vmatpush3.msra.mxu1 %v1393_v12 }
 0xb18   :  { %3987 = vmatprep.subr.bf16.mxu1 %v4409_v15 }
 0xb19   :  { %v4241_v13 = vpop.eup %4240 }
 0xb1a   :  { %v1390_v14 = vmul.f32 %v4241_v13, %v4237_v49 }
 0xb1c   :  { %3980 = vmatmul.mubr.msk.f32.vlgmr.msra.gmra.mrb[14].mxu1 %vm228_vm6, %v1390_v14 }
 0xb1d   :  { %v4243_v16 = vpop.eup %4242  ;;  %3991 = vmatprep.mubr.msk.bf16.mxu1 %vm4410_vm1, %v4409_v15  ;;  %3988 = vmatpush3.bf16.msra.mxu1 %v4186_v46 }
 0xb1e   :  { %v1391_v17 = vmul.f32 %v4243_v16, %v4239_v7  ;;  %3989 = vmatprep.subr.bf16.mxu1 %v4409_v15 }
 0xb20   :  { %3985 = vmatmul.mubr.msk.f32.vlgmr.msra.gmra.mrb[18].mxu0 %vm228_vm6, %v1391_v17 }
 0xb21   :  { %3999 = vmatprep.mubr.msk.bf16.mxu0 %vm4410_vm1, %v4409_v15  ;;  %3990 = vmatpush3.bf16.msra.mxu1 %v4187_v18 }
 0xb22   :  { %4003 = vmatprep.subr.bf16.mxu1 %v4409_v15  ;;  %3996 = vmatpush3.bf16.msra.mxu0 %v4188_v63 }
 0xb23   :  { %3997 = vmatprep.subr.bf16.mxu0 %v4409_v15 }
 0xb26   :  { %3998 = vmatpush3.bf16.msra.mxu0 %v4189_v2 }
 0xb27   :  { %4015 = vmatprep.subr.bf16.mxu0 %v4409_v15 }
 0xbef   :  { %v1464_v19 = vpop.f32.mrb[14].mxu1 }
 0xbf0   :  { %v3981_v20 = vpop.f32.mrb[15].mxu1 }
 0xbf1   :  { %v3746_v20 = vld [vmem:[#allocation7 + $0x6] ss:$0 sm:$0xff] }
 0xbf3   :  { %v1540_v21 = vpop.f32.mrb[18].mxu0 }
 0xbf4   :  { %v4164_v22 = vpack.i.bf16 %v1540_v21, %v1464_v19  ;;  %v3986_v23 = vpop.f32.mrb[19].mxu0 }
 0xbf6   :  { %4165 = vrot.lane.b32.xlu0 %v4164_v22, %s4422_s20 }
 0xc68   :  { %v4166_v30 = vpop.permute.xlu0 %4165 }
 0xc69   :  { %v4168_v35 = vunpack.i.h.bf16 %v4166_v30  ;;  %v4167_v36 = vunpack.i.l.bf16 %v4166_v30 }
 0xc6b   :  { %v1575_v39 = vsel %vm1573_vm10, %v1572_v38, %v4168_v35  ;;  %v1574_v40 = vsel %vm1573_vm10, %v1571_v37, %v4167_v36  ;;  %v3748_v35 = vld [vmem:[#allocation7 + $0x2] ss:$0 sm:$0xff] }
 0xc6c   :  { %v1576_v41 = vpack.c.bf16 %v1575_v39, %v1574_v40 }
 0xc6e   :  { %3992 = vmatmul.mubr.msk.bf16.vlgmr.msra.gmra.mrb[16].mxu1 %vm111_vm0, %v1576_v41 }
 0xc6f   :  { %4011 = vmatprep.mubr.msk.bf16.mxu1 %vm4410_vm1, %v4409_v15  ;;  %4004 = vmatpush3.bf16.msra.mxu1 %v4190_v3 }
 0xc70   :  { %4005 = vmatprep.subr.bf16.mxu1 %v4409_v15 }
 0xc73   :  { %4006 = vmatpush3.bf16.msra.mxu1 %v4191_v4  ;;  %v4194_v4 = vld [vmem:[#allocation5 + $0x50] sm:$0xff]  }
 0xc74   :  { %4007 = vmatprep.subr.bf16.mxu1 %v4409_v15 }
 0xc77   :  { %4008 = vmatpush3.bf16.msra.mxu1 %v4192_v32 }
 0xc78   :  { %4009 = vmatprep.subr.bf16.mxu1 %v4409_v15 }
 0xc7b   :  { %4010 = vmatpush3.bf16.msra.mxu1 %v4193_v34  ;;  %v3760_v34 = vld [vmem:[#allocation7 + $0x8] ss:$0 sm:$0xff] }
 0xc7c   :  { %4033 = vmatprep.subr.mxu1 %v4409_v15 }
 0xd41   :  { %v1630_v42 = vpop.f32.mrb[16].mxu1 }
 0xd42   :  { %v1631_v43 = vadd.f32 %v3742_v33, %v1630_v42  ;;  %v3993_v31 = vpop.f32.mrb[17].mxu1 }
 0xd43   :  { %v1633_v44 = vpop.f32.mrb[18].mxu1  ;;  %v3757_v31 = vld [vmem:[#allocation7 + $0x3] ss:$0 sm:$0xff] }
 0xd44   :  { %v4706_v45 = vadd.f32 %v1631_v43, %v4495_v0  ;;  %v1634_v47 = vadd.f32 %v3742_v33, %v1633_v44  ;;  %v3994_v48 = vpop.f32.mrb[19].mxu1 }
 0xd46   :  { %v4709_v50 = vadd.f32 %v1634_v47, %v4497_v1  ;;  %v1639_v51 = vsel %vm111_vm0, %v4706_v45, 0.0 }
 0xd47   :  { %1640 = vadd.xlane.f32.xlu1 %v1639_v51 }
 0xd48   :  { %v1642_v52 = vsel %vm111_vm0, %v4709_v50, 0.0 }
 0xd49   :  { %1643 = vadd.xlane.f32.xlu0 %v1642_v52 }
 0xdd4   :  { %v1641_v53 = vpop.xlane.xlu1 %1640 }
 0xdd5   :  { %v1645_v54 = vmul.f32 0.03125, %v1641_v53 }
 0xdd6   :  { %v1644_v55 = vpop.xlane.xlu0 %1643 }
 0xdd7   :  { %v1647_v56 = vsub.f32 %v4706_v45, %v1645_v54  ;;  %v1646_v0 = vmul.f32 0.03125, %v1644_v55 }
 0xdd9   :  { %v1648_v57 = vsub.f32 %v4709_v50, %v1646_v0  ;;  %v1649_v58 = vmul.f32 %v1647_v56, %v1647_v56  ;;  %v1681_v22 = vmul.f32 %v3746_v20, %v1647_v56 }
 0xddb   :  { %v1651_v1 = vsel %vm111_vm0, %v1649_v58, 0.0  ;;  %v1650_v59 = vmul.f32 %v1648_v57, %v1648_v57  ;;  %v1682_v23 = vmul.f32 %v3746_v20, %v1648_v57 }
 0xddc   :  { %1652 = vadd.xlane.f32.xlu0 %v1651_v1 }
 0xddd   :  { %v1654_v62 = vsel %vm111_vm0, %v1650_v59, 0.0 }
 0xde0   :  { %1655 = vadd.xlane.f32.xlu0 %v1654_v62 }
 0xe69   :  { %v1653_v5 = vpop.xlane.xlu0 %1652 }
 0xe6a   :  { %v1657_v6 = vmul.f32 0.032258064, %v1653_v5  ;;  %v4195_v5 = vld [vmem:[#allocation5 + $0x58] sm:$0xff]  }
 0xe6c   :  { %4244 = vrsqrt.f32 %v1657_v6  ;;  %vm1661_vm11 = vcmp.eq.f32.partialorder %v1657_v6, inf  ;;  %v1664_v10 = vand.u32 2147483648, %v1657_v6  ;;  %vm1663_vm12 = vcmp.eq.f32.partialorder %v1657_v6, 0.0 }
 0xe6d   :  { %v1656_v49 = vpop.xlane.xlu0 %1655 }
 0xe6e   :  { %v1658_v8 = vmul.f32 0.032258064, %v1656_v49 }
 0xe70   :  { %4246 = vrsqrt.f32 %v1658_v8  ;;  %vm1668_vm13 = vcmp.eq.f32.partialorder %v1658_v8, inf  ;;  %v1671_v17 = vand.u32 2147483648, %v1658_v8  ;;  %vm1670_vm14 = vcmp.eq.f32.partialorder %v1658_v8, 0.0 }
 0xe76   :  { %v4245_v7 = vpop.eup %4244 }
 0xe77   :  { %v1660_v9 = vmul.f32 %v4245_v7, %v1657_v6 }
 0xe79   :  { %v1662_v11 = vsel %vm1661_vm11, %v1657_v6, %v1660_v9 }
 0xe7a   :  { %v4247_v12 = vpop.eup %4246  ;;  %v1665_v13 = vsel %vm1663_vm12, %v1664_v10, %v1662_v11 }
 0xe7b   :  { %v1673_v14 = vadd.f32 1e-06, %v1665_v13  ;;  %v1667_v16 = vmul.f32 %v4247_v12, %v1658_v8 }
 0xe7d   :  { %4248 = vrcp.f32 %v1673_v14  ;;  %v1669_v46 = vsel %vm1668_vm13, %v1658_v8, %v1667_v16  ;;  %vm3635_vm13 = vcmask 1041409  }
 0xe7e   :  { %v1672_v18 = vsel %vm1670_vm14, %v1671_v17, %v1669_v46  ;;  %vm3679_vm14 = vcmask 785408  }
 0xe7f   :  { %v1674_v19 = vadd.f32 1e-06, %v1672_v18 }
 0xe81   :  { %4250 = vrcp.f32 %v1674_v19 }
 0xe87   :  { %v4249_v21 = vpop.eup %4248 }
 0xe88   :  { %v1683_v24 = vmul.f32 %v4249_v21, %v1681_v22  ;;  %v3758_v21 = vld [vmem:[#allocation7 + $0xc] ss:$0 sm:$0xff] }
 0xe8a   :  { %v1689_v28 = vadd.f32 %v3747_v26, %v1683_v24 }
 0xe8b   :  { %v4251_v25 = vpop.eup %4250 }
 0xe8c   :  { %v1684_v27 = vmul.f32 %v4251_v25, %v1682_v23 }
 0xe8e   :  { %v1690_v29 = vadd.f32 %v3747_v26, %v1684_v27  ;;  %v3759_v27 = vld [vmem:[#allocation7 + $0xd] ss:$0 sm:$0xff] }
 0xe90   :  { %v1691_v30 = vpack.c.bf16 %v1690_v29, %v1689_v28 }
 0xe92   :  { %4000 = vmatmul.mubr.msk.bf16.vlgmr.msra.gmra.mrb[20].mxu0 %vm111_vm0, %v1691_v30 }
 0xe93   :  { %4019 = vmatprep.mubr.msk.bf16.mxu0 %vm4410_vm1, %v4409_v15  ;;  %4016 = vmatpush3.bf16.msra.mxu0 %v4194_v4 }
 0xe94   :  { %4017 = vmatprep.subr.bf16.mxu0 %v4409_v15 }
 0xe97   :  { %4018 = vmatpush3.bf16.msra.mxu0 %v4195_v5 }
 0xe98   :  { %4023 = vmatprep.subr.mxu0 %v4409_v15 }
 0xf65   :  { %v1745_v36 = vpop.f32.mrb[20].mxu0 }
 0xf66   :  { %v1746_v37 = vadd.f32 %v3748_v35, %v1745_v36  ;;  %v4001_v38 = vpop.f32.mrb[21].mxu0 }
 0xf67   :  { %v1748_v39 = vpop.f32.mrb[22].mxu0 }
 0xf68   :  { %v1749_v40 = vadd.f32 %v3748_v35, %v1748_v39  ;;  %v4002_v41 = vpop.f32.mrb[23].mxu0  ;;  %v1752_v33 = vmax.f32 %v1746_v37, 0.0 }
 0xf6a   :  { %v1753_v42 = vmax.f32 %v1749_v40, 0.0 }
 0xf6c   :  { %v1754_v43 = vpack.c.bf16 %v1753_v42, %v1752_v33 }
 0xf6e   :  { %4012 = vmatmul.mubr.msk.bf16.vlgmr.msra.gmra.mrb[20].mxu1 %vm1779_vm15, %v1754_v43 }
 0xf6f   :  { %4035 = vmatprep.mubr.msk.f32.mxu1 %vm4410_vm1, %v4409_v15 }
0x1041   :  { %v1817_v44 = vpop.f32.mrb[20].mxu1 }
0x1042   :  { %v1824_v47 = vadd.f32 %v1817_v44, %v4706_v45  ;;  %v4013_v48 = vpop.f32.mrb[21].mxu1 }
0x1043   :  { %v1820_v51 = vpop.f32.mrb[22].mxu1 }
0x1044   :  { %v4732_v52 = vadd.f32 %v3757_v31, %v1824_v47  ;;  %v1825_v53 = vadd.f32 %v1820_v51, %v4709_v50  ;;  %v4014_v54 = vpop.f32.mrb[23].mxu1 }
0x1046   :  { %v4735_v55 = vadd.f32 %v3757_v31, %v1825_v53  ;;  %v1862_v56 = vsel %vm111_vm0, %v4732_v52, 0.0 }
0x1047   :  { %1863 = vadd.xlane.f32.xlu1 %v1862_v56 }
0x1048   :  { %v1865_v0 = vsel %vm111_vm0, %v4735_v55, 0.0 }
0x1049   :  { %1866 = vadd.xlane.f32.xlu0 %v1865_v0 }
0x10d4   :  { %v1864_v57 = vpop.xlane.xlu1 %1863 }
0x10d5   :  { %v1868_v58 = vmul.f32 0.03125, %v1864_v57 }
0x10d6   :  { %v1867_v45 = vpop.xlane.xlu0 %1866 }
0x10d7   :  { %v1870_v1 = vsub.f32 %v4732_v52, %v1868_v58  ;;  %v1869_v59 = vmul.f32 0.03125, %v1867_v45 }
0x10d9   :  { %v1871_v62 = vsub.f32 %v4735_v55, %v1869_v59  ;;  %v1872_v50 = vmul.f32 %v1870_v1, %v1870_v1  ;;  %v1904_v23 = vmul.f32 %v3758_v21, %v1870_v1 }
0x10db   :  { %v1874_v63 = vsel %vm111_vm0, %v1872_v50, 0.0  ;;  %v1873_v2 = vmul.f32 %v1871_v62, %v1871_v62  ;;  %v1905_v24 = vmul.f32 %v3758_v21, %v1871_v62 }
0x10dc   :  { %1875 = vadd.xlane.f32.xlu1 %v1874_v63 }
0x10dd   :  { %v1877_v3 = vsel %vm111_vm0, %v1873_v2, 0.0 }
0x10de   :  { %1878 = vadd.xlane.f32.xlu0 %v1877_v3 }
0x1169   :  { %v1876_v6 = vpop.xlane.xlu1 %1875 }
0x116a   :  { %v1880_v49 = vmul.f32 0.032258064, %v1876_v6 }
0x116b   :  { %v1879_v8 = vpop.xlane.xlu0 %1878 }
0x116c   :  { %4252 = vrsqrt.f32 %v1880_v49  ;;  %v1881_v7 = vmul.f32 0.032258064, %v1879_v8  ;;  %vm1884_vm2 = vcmp.eq.f32.partialorder %v1880_v49, inf  ;;  %v1887_v11 = vand.u32 2147483648, %v1880_v49 }
0x116d   :  { %vm1886_vm3 = vcmp.eq.f32.partialorder %v1880_v49, 0.0 }
0x116e   :  { %4254 = vrsqrt.f32 %v1881_v7  ;;  %vm1891_vm4 = vcmp.eq.f32.partialorder %v1881_v7, inf  ;;  %v1894_v46 = vand.u32 2147483648, %v1881_v7  ;;  %vm1893_vm5 = vcmp.eq.f32.partialorder %v1881_v7, 0.0 }
0x1176   :  { %v4253_v9 = vpop.eup %4252 }
0x1177   :  { %v1883_v10 = vmul.f32 %v4253_v9, %v1880_v49 }
0x1178   :  { %v4255_v12 = vpop.eup %4254 }
0x1179   :  { %v1885_v13 = vsel %vm1884_vm2, %v1880_v49, %v1883_v10  ;;  %v1890_v16 = vmul.f32 %v4255_v12, %v1881_v7 }
0x117a   :  { %v1888_v14 = vsel %vm1886_vm3, %v1887_v11, %v1885_v13 }
0x117b   :  { %v1896_v17 = vadd.f32 1e-06, %v1888_v14  ;;  %v1892_v18 = vsel %vm1891_vm4, %v1881_v7, %v1890_v16 }
0x117c   :  { %v1895_v19 = vsel %vm1893_vm5, %v1894_v46, %v1892_v18 }
0x117d   :  { %4256 = vrcp.f32 %v1896_v17  ;;  %v1897_v20 = vadd.f32 1e-06, %v1895_v19 }
0x117f   :  { %4258 = vrcp.f32 %v1897_v20 }
0x1187   :  { %v4257_v22 = vpop.eup %4256 }
0x1188   :  { %v1906_v25 = vmul.f32 %v4257_v22, %v1904_v23 }
0x1189   :  { %v4259_v26 = vpop.eup %4258 }
0x118a   :  { %v1907_v28 = vmul.f32 %v4259_v26, %v1905_v24  ;;  %v1912_v29 = vadd.f32 %v3759_v27, %v1906_v25 }
0x118c   :  { %v1913_v30 = vadd.f32 %v3759_v27, %v1907_v28 }
0x118e   :  { %v1914_v32 = vpack.c.bf16 %v1913_v30, %v1912_v29 }
0x1190   :  { %4020 = vmatmul.mubr.msk.bf16.vlgmr.msra.gmra.mrb[24].mxu0 %vm111_vm0, %v1914_v32 }
0x1191   :  { %4025 = vmatprep.mubr.msk.f32.mxu0 %vm4410_vm1, %v4409_v15 }
0x1263   :  { %v1968_v35 = vpop.f32.mrb[24].mxu0 }
0x1264   :  { %v4750_v36 = vadd.f32 %v3760_v34, %v1968_v35  ;;  %v4021_v37 = vpop.f32.mrb[25].mxu0 }
0x1265   :  { %v1971_v38 = vpop.f32.mrb[26].mxu0 }
0x1266   :  { %v4752_v39 = vadd.f32 %v3760_v34, %v1971_v38  ;;  %1976 = vrot.lane.b32.xlu1 %v4750_v36, %s4411_s3  ;;  %v4022_v40 = vpop.f32.mrb[27].mxu0 }
0x1268   :  { %2053 = vrot.lane.b32.xlu0 %v4752_v39, %s4411_s3 }
0x12d8   :  { %v1977_v41 = vpop.permute.xlu1 %1976 }
0x12d9   :  { %4024 = vmatpush3.xpose.msk.msra.mxu0 %vm228_vm6, %v1977_v41 }
0x12da   :  { %4028 = vmatprep.subr.mxu0 %v4409_v15  ;;  %v2054_v33 = vpop.permute.xlu0 %2053 }
0x12dc   :  { %4026 = vmatmul.mubr.msk.f32.vlgmr.msra.gmra.mrb[28].mxu0 %vm228_vm6, %v4750_v36 }
0x12dd   :  { %4029 = vmatpush3.xpose.msk.msra.mxu0 %vm228_vm6, %v2054_v33  ;;  %4030 = vmatprep.mubr.msk.f32.mxu0 %vm4410_vm1, %v4409_v15 }
0x12de   :  { %4038 = vmatprep.subr.mxu0 %v4409_v15 }
0x12e0   :  { %4031 = vmatmul.mubr.msk.f32.vlgmr.msra.gmra.mrb[30].mxu0 %vm228_vm6, %v4752_v39 }
0x12e1   :  { %4040 = vmatprep.mubr.msk.f32.mxu0 %vm4410_vm1, %v4409_v15 }
0x13af   :  { %v2048_v42 = vpop.f32.mrb[28].mxu0 }
0x13b0   :  { %v2049_v43 = vadd.f32 %v2048_v42, %v4546_v60  ;;  %v4027_v31 = vpop.f32.mrb[29].mxu0 }
0x13b2   :  { %v2129_v44 = vsel %vm228_vm6, %v2049_v43, -inf }
0x13b3   :  { %2130 = vmax.xlane.f32.xlu1 %v2129_v44  ;;  %v2125_v47 = vpop.f32.mrb[30].mxu0 }
0x13b4   :  { %v2126_v48 = vadd.f32 %v2125_v47, %v4548_v61  ;;  %v4032_v51 = vpop.f32.mrb[31].mxu0 }
0x13b6   :  { %v2132_v53 = vsel %vm228_vm6, %v2126_v48, -inf }
0x13b7   :  { %2133 = vmax.xlane.f32.xlu0 %v2132_v53 }
0x13c4   :  { %2151 = vrot.lane.b32.xlu1 %v4750_v36, %s4403_s28 }
0x13c8   :  { %2305 = vrot.lane.b32.xlu1 %v4750_v36, %s4412_s1 }
0x13cc   :  { %2383 = vrot.lane.b32.xlu1 %v4752_v39, %s4412_s1 }
0x13cd   :  { %2227 = vrot.lane.b32.xlu0 %v4752_v39, %s4403_s28 }
0x1440   :  { %v2131_v54 = vpop.xlane.xlu1 %2130 }
0x1441   :  { %v2135_v56 = vsub.f32 %v2049_v43, %v2131_v54 }
0x1443   :  { %v2137_v0 = vmul.f32 1.442695, %v2135_v56 }
0x1444   :  { %v2152_v57 = vpop.permute.xlu1 %2151  ;;  %v2134_v58 = vpop.xlane.xlu0 %2133 }
0x1445   :  { %4260 = vpow2.f32 %v2137_v0  ;;  %v2136_v45 = vsub.f32 %v2126_v48, %v2134_v58  ;;  %4034 = vmatpush3.msra.mxu1 %v2152_v57 }
0x1446   :  { %4043 = vmatprep.subr.mxu1 %v4409_v15 }
0x1447   :  { %v2139_v1 = vmul.f32 1.442695, %v2136_v45 }
0x1448   :  { %v2228_v59 = vpop.permute.xlu0 %2227  ;;  %v2306_v3 = vpop.permute.xlu1 %2305 }
0x1449   :  { %4262 = vpow2.f32 %v2139_v1  ;;  %4039 = vmatpush3.msra.mxu0 %v2228_v59 }
0x144a   :  { %4048 = vmatprep.subr.mxu0 %v4409_v15 }
0x144c   :  { %v2384_v4 = vpop.permute.xlu1 %2383 }
0x144f   :  { %v4261_v62 = vpop.eup %4260 }
0x1450   :  { %v2141_v50 = vsel %vm228_vm6, %v4261_v62, 0.0 }
0x1451   :  { %2142 = vadd.xlane.f32.xlu1 %v2141_v50 }
0x1453   :  { %v4263_v63 = vpop.eup %4262 }
0x1454   :  { %v2144_v2 = vsel %vm228_vm6, %v4263_v63, 0.0 }
0x1455   :  { %2145 = vadd.xlane.f32.xlu0 %v2144_v2 }
0x1462   :  { %2303 = vrot.lane.b32.xlu1 %v4750_v36, %s4413_s11 }
0x146b   :  { %2381 = vrot.lane.b32.xlu0 %v4752_v39, %s4413_s11 }
0x14de   :  { %v2143_v5 = vpop.xlane.xlu1 %2142 }
0x14df   :  { %4264 = vrcp.f32 %v2143_v5 }
0x14e2   :  { %v2146_v6 = vpop.xlane.xlu0 %2145  ;;  %v2304_v10 = vpop.permute.xlu1 %2303 }
0x14e3   :  { %4266 = vrcp.f32 %v2146_v6 }
0x14e6   :  { %v2382_v11 = vpop.permute.xlu0 %2381 }
0x14e9   :  { %v4265_v49 = vpop.eup %4264 }
0x14ea   :  { %v2149_v8 = vmul.f32 %v4265_v49, %v4261_v62 }
0x14ec   :  { %4036 = vmatmul.mubr.msk.f32.vlgmr.msra.gmra.mrb[24].mxu1 %vm228_vm6, %v2149_v8 }
0x14ed   :  { %v4267_v7 = vpop.eup %4266  ;;  %4044 = vmatpush3.xpose.msk.msra.mxu1 %vm228_vm6, %v2306_v3  ;;  %4045 = vmatprep.mubr.msk.f32.mxu1 %vm4410_vm1, %v4409_v15 }
0x14ee   :  { %v2150_v9 = vmul.f32 %v4267_v7, %v4263_v63  ;;  %4053 = vmatprep.subr.mxu1 %v4409_v15 }
0x14f0   :  { %4041 = vmatmul.mubr.msk.f32.vlgmr.msra.gmra.mrb[32].mxu0 %vm228_vm6, %v2150_v9  ;;  %4046 = vmatmul.mubr.msk.f32.vlgmr.msra.gmra.mrb[26].mxu1 %vm228_vm6, %v2304_v10 }
0x14f1   :  { %4049 = vmatpush3.xpose.msk.msra.mxu0 %vm228_vm6, %v2384_v4  ;;  %4050 = vmatprep.mubr.msk.f32.mxu0 %vm4410_vm1, %v4409_v15 }
0x14f2   :  { %4058 = vmatprep.subr.mxu0 %v4409_v15  ;;  %4055 = vmatprep.mubr.msk.f32.mxu1 %vm4410_vm1, %v4409_v15 }
0x14f4   :  { %4051 = vmatmul.mubr.msk.f32.vlgmr.msra.gmra.mrb[34].mxu0 %vm228_vm6, %v2382_v11 }
0x14f5   :  { %4060 = vmatprep.mubr.msk.f32.mxu0 %vm4410_vm1, %v4409_v15 }
0x15bf   :  { %v4806_v12 = vpop.f32.mrb[24].mxu1 }
0x15c0   :  { %v4037_v13 = vpop.f32.mrb[25].mxu1 }
0x15c3   :  { %v4808_v14 = vpop.f32.mrb[32].mxu0  ;;  %v2377_v16 = vpop.f32.mrb[26].mxu1 }
0x15c4   :  { %v2378_v17 = vadd.f32 %v2377_v16, %v4546_v60  ;;  %v4042_v46 = vpop.f32.mrb[33].mxu0  ;;  %v4047_v18 = vpop.f32.mrb[27].mxu1 }
0x15c6   :  { %v2459_v19 = vsel %vm228_vm6, %v2378_v17, -inf }
0x15c7   :  { %2460 = vmax.xlane.f32.xlu1 %v2459_v19  ;;  %v2455_v20 = vpop.f32.mrb[34].mxu0 }
0x15c8   :  { %v2456_v21 = vadd.f32 %v2455_v20, %v4548_v61  ;;  %v4052_v22 = vpop.f32.mrb[35].mxu0 }
0x15ca   :  { %v2462_v23 = vsel %vm228_vm6, %v2456_v21, -inf }
0x15cb   :  { %2463 = vmax.xlane.f32.xlu0 %v2462_v23 }
0x15d8   :  { %2481 = vrot.lane.b32.xlu1 %v4750_v36, %s4414_s12 }
0x15dc   :  { %2635 = vrot.lane.b32.xlu1 %v4750_v36, %s4415_s13 }
0x15e0   :  { %2713 = vrot.lane.b32.xlu1 %v4752_v39, %s4415_s13 }
0x15e1   :  { %2557 = vrot.lane.b32.xlu0 %v4752_v39, %s4414_s12 }
0x15e4   :  { %2633 = vrot.lane.b32.xlu1 %v4750_v36, %s4416_s14 }
0x1654   :  { %v2461_v24 = vpop.xlane.xlu1 %2460 }
0x1655   :  { %v2465_v25 = vsub.f32 %v2378_v17, %v2461_v24 }
0x1657   :  { %v2467_v26 = vmul.f32 1.442695, %v2465_v25 }
0x1658   :  { %v2482_v27 = vpop.permute.xlu1 %2481  ;;  %v2464_v28 = vpop.xlane.xlu0 %2463 }
0x1659   :  { %4268 = vpow2.f32 %v2467_v26  ;;  %v2466_v29 = vsub.f32 %v2456_v21, %v2464_v28  ;;  %4054 = vmatpush3.msra.mxu1 %v2482_v27 }
0x165a   :  { %4063 = vmatprep.subr.mxu1 %v4409_v15 }
0x165b   :  { %v2469_v30 = vmul.f32 1.442695, %v2466_v29 }
0x165c   :  { %v2558_v32 = vpop.permute.xlu0 %2557  ;;  %v2636_v33 = vpop.permute.xlu1 %2635 }
0x165d   :  { %4270 = vpow2.f32 %v2469_v30  ;;  %4059 = vmatpush3.msra.mxu0 %v2558_v32 }
0x165e   :  { %4068 = vmatprep.subr.mxu0 %v4409_v15 }
0x1660   :  { %v2714_v43 = vpop.permute.xlu1 %2713 }
0x1663   :  { %v4269_v34 = vpop.eup %4268 }
0x1664   :  { %v2471_v35 = vsel %vm228_vm6, %v4269_v34, 0.0  ;;  %v2634_v48 = vpop.permute.xlu1 %2633 }
0x1665   :  { %2472 = vadd.xlane.f32.xlu0 %v2471_v35 }
0x1667   :  { %v4271_v37 = vpop.eup %4270 }
0x1668   :  { %v2474_v38 = vsel %vm228_vm6, %v4271_v37, 0.0 }
0x1669   :  { %2475 = vadd.xlane.f32.xlu0 %v2474_v38 }
0x167f   :  { %2711 = vrot.lane.b32.xlu0 %v4752_v39, %s4416_s14 }
0x16f2   :  { %v2473_v40 = vpop.xlane.xlu0 %2472 }
0x16f3   :  { %4272 = vrcp.f32 %v2473_v40 }
0x16f6   :  { %v2476_v41 = vpop.xlane.xlu0 %2475 }
0x16f7   :  { %4274 = vrcp.f32 %v2476_v41 }
0x16fa   :  { %v2712_v51 = vpop.permute.xlu0 %2711 }
0x16fd   :  { %v4273_v42 = vpop.eup %4272 }
0x16fe   :  { %v2479_v31 = vmul.f32 %v4273_v42, %v4269_v34 }
0x1700   :  { %4056 = vmatmul.mubr.msk.f32.vlgmr.msra.gmra.mrb[28].mxu1 %vm228_vm6, %v2479_v31 }
0x1701   :  { %v4275_v44 = vpop.eup %4274  ;;  %4064 = vmatpush3.xpose.msk.msra.mxu1 %vm228_vm6, %v2636_v33  ;;  %4065 = vmatprep.mubr.msk.f32.mxu1 %vm4410_vm1, %v4409_v15 }
0x1702   :  { %v2480_v47 = vmul.f32 %v4275_v44, %v4271_v37  ;;  %4073 = vmatprep.subr.mxu1 %v4409_v15 }
0x1704   :  { %4061 = vmatmul.mubr.msk.f32.vlgmr.msra.gmra.mrb[36].mxu0 %vm228_vm6, %v2480_v47  ;;  %4066 = vmatmul.mubr.msk.f32.vlgmr.msra.gmra.mrb[30].mxu1 %vm228_vm6, %v2634_v48 }
0x1705   :  { %4069 = vmatpush3.xpose.msk.msra.mxu0 %vm228_vm6, %v2714_v43  ;;  %4070 = vmatprep.mubr.msk.f32.mxu0 %vm4410_vm1, %v4409_v15 }
0x1706   :  { %4078 = vmatprep.subr.mxu0 %v4409_v15  ;;  %4075 = vmatprep.mubr.msk.f32.mxu1 %vm4410_vm1, %v4409_v15 }
0x1708   :  { %4071 = vmatmul.mubr.msk.f32.vlgmr.msra.gmra.mrb[38].mxu0 %vm228_vm6, %v2712_v51 }
0x1709   :  { %4080 = vmatprep.mubr.msk.f32.mxu0 %vm4410_vm1, %v4409_v15 }
0x17d3   :  { %v4846_v53 = vpop.f32.mrb[28].mxu1 }
0x17d4   :  { %v4057_v54 = vpop.f32.mrb[29].mxu1 }
0x17d7   :  { %v4848_v56 = vpop.f32.mrb[36].mxu0  ;;  %v2707_v0 = vpop.f32.mrb[30].mxu1 }
0x17d8   :  { %v4169_v57 = vpack.i.bf16 %v4848_v56, %v4846_v53  ;;  %v2708_v58 = vadd.f32 %v2707_v0, %v4546_v60  ;;  %v4062_v45 = vpop.f32.mrb[37].mxu0  ;;  %v4067_v1 = vpop.f32.mrb[31].mxu1 }
0x17da   :  { %v2789_v59 = vsel %vm228_vm6, %v2708_v58, -inf }
0x17db   :  { %2790 = vmax.xlane.f32.xlu1 %v2789_v59  ;;  %v2785_v62 = vpop.f32.mrb[38].mxu0  ;;  %v4197_v59 = vld [vmem:[#allocation5 + $0x68] sm:$0xff]  }
0x17dc   :  { %v2786_v50 = vadd.f32 %v2785_v62, %v4548_v61  ;;  %v4072_v63 = vpop.f32.mrb[39].mxu0 }
0x17de   :  { %v2792_v2 = vsel %vm228_vm6, %v2786_v50, -inf }
0x17df   :  { %2793 = vmax.xlane.f32.xlu0 %v2792_v2 }
0x17ec   :  { %2811 = vrot.lane.b32.xlu1 %v4750_v36, %s4417_s15 }
0x17f0   :  { %2965 = vrot.lane.b32.xlu1 %v4750_v36, %s4418_s16 }
0x17f4   :  { %3043 = vrot.lane.b32.xlu1 %v4752_v39, %s4418_s16 }
0x17f5   :  { %2887 = vrot.lane.b32.xlu0 %v4752_v39, %s4417_s15 }
0x17f8   :  { %2963 = vrot.lane.b32.xlu1 %v4750_v36, %s4419_s2 }
0x1868   :  { %v2791_v3 = vpop.xlane.xlu1 %2790 }
0x1869   :  { %v2795_v4 = vsub.f32 %v2708_v58, %v2791_v3 }
0x186b   :  { %v2797_v5 = vmul.f32 1.442695, %v2795_v4 }
0x186c   :  { %v2812_v6 = vpop.permute.xlu1 %2811  ;;  %v2794_v49 = vpop.xlane.xlu0 %2793 }
0x186d   :  { %4276 = vpow2.f32 %v2797_v5  ;;  %v2796_v8 = vsub.f32 %v2786_v50, %v2794_v49  ;;  %4074 = vmatpush3.msra.mxu1 %v2812_v6 }
0x186e   :  { %4083 = vmatprep.subr.mxu1 %v4409_v15 }
0x186f   :  { %v2799_v7 = vmul.f32 1.442695, %v2796_v8 }
0x1870   :  { %v2888_v9 = vpop.permute.xlu0 %2887  ;;  %v2966_v18 = vpop.permute.xlu1 %2965 }
0x1871   :  { %4278 = vpow2.f32 %v2799_v7  ;;  %4079 = vmatpush3.msra.mxu0 %v2888_v9 }
0x1872   :  { %4088 = vmatprep.subr.mxu0 %v4409_v15 }
0x1874   :  { %v3044_v20 = vpop.permute.xlu1 %3043 }
0x1877   :  { %v4277_v10 = vpop.eup %4276 }
0x1878   :  { %v2801_v11 = vsel %vm228_vm6, %v4277_v10, 0.0  ;;  %v2964_v24 = vpop.permute.xlu1 %2963 }
0x1879   :  { %2802 = vadd.xlane.f32.xlu0 %v2801_v11 }
0x187b   :  { %v4279_v13 = vpop.eup %4278 }
0x187c   :  { %v2804_v16 = vsel %vm228_vm6, %v4279_v13, 0.0 }
0x187d   :  { %2805 = vadd.xlane.f32.xlu0 %v2804_v16 }
0x1893   :  { %3041 = vrot.lane.b32.xlu0 %v4752_v39, %s4419_s2 }
0x1906   :  { %v2803_v17 = vpop.xlane.xlu0 %2802 }
0x1907   :  { %4280 = vrcp.f32 %v2803_v17 }
0x190a   :  { %v2806_v46 = vpop.xlane.xlu0 %2805 }
0x190b   :  { %4282 = vrcp.f32 %v2806_v46 }
0x190e   :  { %v3042_v25 = vpop.permute.xlu0 %3041 }
0x1911   :  { %v4281_v19 = vpop.eup %4280 }
0x1912   :  { %v2809_v21 = vmul.f32 %v4281_v19, %v4277_v10 }
0x1914   :  { %4076 = vmatmul.mubr.msk.f32.vlgmr.msra.gmra.mrb[32].mxu1 %vm228_vm6, %v2809_v21 }
0x1915   :  { %v4283_v22 = vpop.eup %4282  ;;  %4084 = vmatpush3.xpose.msk.msra.mxu1 %vm228_vm6, %v2966_v18  ;;  %4085 = vmatprep.mubr.msk.f32.mxu1 %vm4410_vm1, %v4409_v15 }
0x1916   :  { %v2810_v23 = vmul.f32 %v4283_v22, %v4279_v13  ;;  %4093 = vmatprep.subr.mxu1 %v4409_v15 }
0x1918   :  { %4081 = vmatmul.mubr.msk.f32.vlgmr.msra.gmra.mrb[40].mxu0 %vm228_vm6, %v2810_v23  ;;  %4086 = vmatmul.mubr.msk.f32.vlgmr.msra.gmra.mrb[34].mxu1 %vm228_vm6, %v2964_v24 }
0x1919   :  { %4089 = vmatpush3.xpose.msk.msra.mxu0 %vm228_vm6, %v3044_v20  ;;  %4090 = vmatprep.mubr.msk.f32.mxu0 %vm4410_vm1, %v4409_v15 }
0x191a   :  { %4098 = vmatprep.subr.mxu0 %v4409_v15  ;;  %4095 = vmatprep.mubr.msk.f32.mxu1 %vm4410_vm1, %v4409_v15 }
0x191c   :  { %4091 = vmatmul.mubr.msk.f32.vlgmr.msra.gmra.mrb[42].mxu0 %vm228_vm6, %v3042_v25 }
0x191d   :  { %4100 = vmatprep.mubr.msk.f32.mxu0 %vm4410_vm1, %v4409_v15 }
0x19e7   :  { %v2883_v26 = vpop.f32.mrb[32].mxu1 }
0x19e8   :  { %v4077_v27 = vpop.f32.mrb[33].mxu1 }
0x19eb   :  { %v2959_v28 = vpop.f32.mrb[40].mxu0  ;;  %v3037_v29 = vpop.f32.mrb[34].mxu1 }
0x19ec   :  { %v4174_v30 = vpack.i.bf16 %v2959_v28, %v2883_v26  ;;  %v3038_v32 = vadd.f32 %v3037_v29, %v4546_v60  ;;  %v4082_v34 = vpop.f32.mrb[41].mxu0  ;;  %v4087_v35 = vpop.f32.mrb[35].mxu1 }
0x19ee   :  { %v3119_v37 = vsel %vm228_vm6, %v3038_v32, -inf }
0x19ef   :  { %3120 = vmax.xlane.f32.xlu1 %v3119_v37  ;;  %v3115_v38 = vpop.f32.mrb[42].mxu0 }
0x19f0   :  { %v3116_v40 = vadd.f32 %v3115_v38, %v4548_v61  ;;  %v4092_v41 = vpop.f32.mrb[43].mxu0 }
0x19f2   :  { %v3122_v33 = vsel %vm228_vm6, %v3116_v40, -inf }
0x19f3   :  { %3123 = vmax.xlane.f32.xlu0 %v3122_v33  ;;  %v4198_v33 = vld [vmem:[#allocation5 + $0x70] sm:$0xff]  }
0x1a00   :  { %3141 = vrot.lane.b32.xlu1 %v4750_v36, %s4420_s18 }
0x1a04   :  { %4170 = vrot.lane.b32.xlu1 %v4169_v57, %s4407_s17 }
0x1a08   :  { %4175 = vrot.lane.b32.xlu1 %v4174_v30, %s4421_s19 }
0x1a7c   :  { %v3121_v60 = vpop.xlane.xlu1 %3120 }
0x1a7d   :  { %v3125_v42 = vsub.f32 %v3038_v32, %v3121_v60  ;;  %v4199_v60 = vld [vmem:[#allocation5 + $0x78] sm:$0xff]  }
0x1a7f   :  { %v3127_v43 = vmul.f32 1.442695, %v3125_v42  ;;  %v4200_v42 = vld [vmem:[#allocation5 + $0x80] sm:$0xff]  }
0x1a80   :  { %v3142_v31 = vpop.permute.xlu1 %3141  ;;  %v3124_v44 = vpop.xlane.xlu0 %3123 }
0x1a81   :  { %4284 = vpow2.f32 %v3127_v43  ;;  %v3126_v61 = vsub.f32 %v3116_v40, %v3124_v44  ;;  %4094 = vmatpush3.msra.mxu1 %v3142_v31  ;;  %v4201_v43 = vld [vmem:[#allocation5 + $0x88] sm:$0xff]  }
0x1a82   :  { %4103 = vmatprep.subr.bf16.mxu1 %v4409_v15 }
0x1a83   :  { %v3129_v47 = vmul.f32 1.442695, %v3126_v61 }
0x1a84   :  { %v4171_v4 = vpop.permute.xlu1 %4170 }
0x1a85   :  { %4286 = vpow2.f32 %v3129_v47  ;;  %v4173_v6 = vunpack.i.h.bf16 %v4171_v4  ;;  %v4172_v49 = vunpack.i.l.bf16 %v4171_v4  ;;  %v3793_v4 = vld [vmem:[#allocation7 + $0xf] ss:$0 sm:$0xff] }
0x1a87   :  { %v3318_v10 = vsel %vm228_vm6, %v4808_v14, %v4173_v6  ;;  %v3317_v11 = vsel %vm228_vm6, %v4806_v12, %v4172_v49  ;;  %v3788_v14 = vld [vmem:[#allocation7 + $0x9] ss:$0 sm:$0xff] }
0x1a88   :  { %v4176_v5 = vpop.permute.xlu1 %4175 }
0x1a89   :  { %v4178_v8 = vunpack.i.h.bf16 %v4176_v5  ;;  %v4177_v7 = vunpack.i.l.bf16 %v4176_v5 }
0x1a8b   :  { %v4285_v36 = vpop.eup %4284  ;;  %v3320_v17 = vsel %vm1570_vm9, %v3318_v10, %v4178_v8  ;;  %v3319_v46 = vsel %vm1570_vm9, %v3317_v11, %v4177_v7  ;;  %v4202_v7 = vld [vmem:[#allocation5 + $0x90] sm:$0xff]   ;;  %v3794_v10 = vld [vmem:[#allocation7 + $0xa] ss:$0 sm:$0xff] }
0x1a8c   :  { %v3131_v48 = vsel %vm228_vm6, %v4285_v36, 0.0 }
0x1a8d   :  { %3132 = vadd.xlane.f32.xlu0 %v3131_v48 }
0x1a8f   :  { %v4287_v51 = vpop.eup %4286 }
0x1a90   :  { %v3134_v53 = vsel %vm228_vm6, %v4287_v51, 0.0 }
0x1a91   :  { %3135 = vadd.xlane.f32.xlu0 %v3134_v53 }
0x1aa7   :  { %3217 = vrot.lane.b32.xlu0 %v4752_v39, %s4420_s18  ;;  %v4196_v39 = vld [vmem:[#allocation5 + $0x60] sm:$0xff]  }
0x1b1a   :  { %v3133_v54 = vpop.xlane.xlu0 %3132 }
0x1b1b   :  { %4288 = vrcp.f32 %v3133_v54 }
0x1b1e   :  { %v3136_v56 = vpop.xlane.xlu0 %3135 }
0x1b1f   :  { %4290 = vrcp.f32 %v3136_v56 }
0x1b22   :  { %v3218_v0 = vpop.permute.xlu0 %3217 }
0x1b23   :  { %4099 = vmatpush3.msra.mxu0 %v3218_v0 }
0x1b24   :  { %4111 = vmatprep.subr.bf16.mxu0 %v4409_v15 }
0x1b25   :  { %v4289_v57 = vpop.eup %4288 }
0x1b26   :  { %v3139_v58 = vmul.f32 %v4289_v57, %v4285_v36 }
0x1b28   :  { %4096 = vmatmul.mubr.msk.f32.vlgmr.msra.gmra.mrb[36].mxu1 %vm228_vm6, %v3139_v58 }
0x1b29   :  { %v4291_v45 = vpop.eup %4290  ;;  %4107 = vmatprep.mubr.msk.bf16.mxu1 %vm4410_vm1, %v4409_v15  ;;  %4104 = vmatpush3.bf16.msra.mxu1 %v4196_v39 }
0x1b2a   :  { %v3140_v1 = vmul.f32 %v4291_v45, %v4287_v51  ;;  %4105 = vmatprep.subr.bf16.mxu1 %v4409_v15 }
0x1b2c   :  { %4101 = vmatmul.mubr.msk.f32.vlgmr.msra.gmra.mrb[44].mxu0 %vm228_vm6, %v3140_v1 }
0x1b2d   :  { %4115 = vmatprep.mubr.msk.bf16.mxu0 %vm4410_vm1, %v4409_v15  ;;  %4106 = vmatpush3.bf16.msra.mxu1 %v4197_v59  ;;  %v3792_v59 = vld [vmem:[#allocation7 + $0xe] ss:$0 sm:$0xff] }
0x1b2e   :  { %4119 = vmatprep.subr.bf16.mxu1 %v4409_v15  ;;  %4112 = vmatpush3.bf16.msra.mxu0 %v4198_v33 }
0x1b2f   :  { %4113 = vmatprep.subr.bf16.mxu0 %v4409_v15 }
0x1b32   :  { %4114 = vmatpush3.bf16.msra.mxu0 %v4199_v60 }
0x1bfb   :  { %v3213_v62 = vpop.f32.mrb[36].mxu1 }
0x1bfc   :  { %v4097_v50 = vpop.f32.mrb[37].mxu1 }
0x1bff   :  { %v3289_v63 = vpop.f32.mrb[44].mxu0 }
0x1c00   :  { %v4179_v2 = vpack.i.bf16 %v3289_v63, %v3213_v62  ;;  %v4102_v3 = vpop.f32.mrb[45].mxu0 }
0x1c02   :  { %4180 = vrot.lane.b32.xlu1 %v4179_v2, %s4422_s20 }
0x1c74   :  { %v4181_v9 = vpop.permute.xlu1 %4180 }
0x1c75   :  { %v4183_v13 = vunpack.i.h.bf16 %v4181_v9  ;;  %v4182_v16 = vunpack.i.l.bf16 %v4181_v9  ;;  %v4203_v9 = vld [vmem:[#allocation5 + $0x98] sm:$0xff]  }
0x1c77   :  { %v3322_v18 = vsel %vm1573_vm10, %v3320_v17, %v4183_v13  ;;  %v3321_v19 = vsel %vm1573_vm10, %v3319_v46, %v4182_v16 }
0x1c78   :  { %v3323_v20 = vpack.c.bf16 %v3322_v18, %v3321_v19 }
0x1c7a   :  { %4108 = vmatmul.mubr.msk.bf16.vlgmr.msra.gmra.mrb[40].mxu1 %vm111_vm0, %v3323_v20 }
0x1c7b   :  { %4127 = vmatprep.mubr.msk.bf16.mxu1 %vm4410_vm1, %v4409_v15  ;;  %4120 = vmatpush3.bf16.msra.mxu1 %v4200_v42 }
0x1c7c   :  { %4121 = vmatprep.subr.bf16.mxu1 %v4409_v15 }
0x1c7f   :  { %4122 = vmatpush3.bf16.msra.mxu1 %v4201_v43 }
0x1c80   :  { %4123 = vmatprep.subr.bf16.mxu1 %v4409_v15 }
0x1c83   :  { %4124 = vmatpush3.bf16.msra.mxu1 %v4202_v7 }
0x1c84   :  { %4125 = vmatprep.subr.bf16.mxu1 %v4409_v15 }
0x1c87   :  { %4126 = vmatpush3.bf16.msra.mxu1 %v4203_v9 }
0x1d4d   :  { %v3377_v21 = vpop.f32.mrb[40].mxu1 }
0x1d4e   :  { %v3378_v22 = vadd.f32 %v3788_v14, %v3377_v21  ;;  %v4109_v12 = vpop.f32.mrb[41].mxu1  ;;  %v3803_v21 = vld [vmem:[#allocation7 + $0xb] ss:$0 sm:$0xff] }
0x1d4f   :  { %v3380_v23 = vpop.f32.mrb[42].mxu1 }
0x1d50   :  { %v4926_v24 = vadd.f32 %v3378_v22, %v4732_v52  ;;  %v3381_v25 = vadd.f32 %v3788_v14, %v3380_v23  ;;  %v4110_v26 = vpop.f32.mrb[43].mxu1 }
0x1d52   :  { %v4929_v27 = vadd.f32 %v3381_v25, %v4735_v55  ;;  %v3386_v28 = vsel %vm111_vm0, %v4926_v24, 0.0 }
0x1d53   :  { %3387 = vadd.xlane.f32.xlu0 %v3386_v28 }
0x1d54   :  { %v3389_v29 = vsel %vm111_vm0, %v4929_v27, 0.0 }
0x1d55   :  { %3390 = vadd.xlane.f32.xlu1 %v3389_v29 }
0x1de0   :  { %v3388_v30 = vpop.xlane.xlu0 %3387 }
0x1de1   :  { %v3392_v32 = vmul.f32 0.03125, %v3388_v30 }
0x1de2   :  { %v3391_v34 = vpop.xlane.xlu1 %3390 }
0x1de3   :  { %v3394_v35 = vsub.f32 %v4926_v24, %v3392_v32  ;;  %v3393_v52 = vmul.f32 0.03125, %v3391_v34 }
0x1de5   :  { %v3395_v37 = vsub.f32 %v4929_v27, %v3393_v52  ;;  %v3396_v38 = vmul.f32 %v3394_v35, %v3394_v35  ;;  %v3428_v50 = vmul.f32 %v3792_v59, %v3394_v35 }
0x1de7   :  { %v3398_v55 = vsel %vm111_vm0, %v3396_v38, 0.0  ;;  %v3397_v40 = vmul.f32 %v3395_v37, %v3395_v37  ;;  %v3429_v63 = vmul.f32 %v3792_v59, %v3395_v37 }
0x1de8   :  { %3399 = vadd.xlane.f32.xlu0 %v3398_v55 }
0x1de9   :  { %v3401_v41 = vsel %vm111_vm0, %v3397_v40, 0.0 }
0x1dec   :  { %3402 = vadd.xlane.f32.xlu0 %v3401_v41 }
0x1e75   :  { %v3400_v31 = vpop.xlane.xlu0 %3399 }
0x1e76   :  { %v3404_v44 = vmul.f32 0.032258064, %v3400_v31 }
0x1e78   :  { %4292 = vrsqrt.f32 %v3404_v44  ;;  %vm3408_vm1 = vcmp.eq.f32.partialorder %v3404_v44, inf  ;;  %v3411_v51 = vand.u32 2147483648, %v3404_v44  ;;  %vm3410_vm6 = vcmp.eq.f32.partialorder %v3404_v44, 0.0 }
0x1e79   :  { %v3403_v61 = vpop.xlane.xlu0 %3402 }
0x1e7a   :  { %v3405_v47 = vmul.f32 0.032258064, %v3403_v61 }
0x1e7c   :  { %4294 = vrsqrt.f32 %v3405_v47  ;;  %vm3415_vm7 = vcmp.eq.f32.partialorder %v3405_v47, inf  ;;  %v3418_v58 = vand.u32 2147483648, %v3405_v47  ;;  %vm3417_vm8 = vcmp.eq.f32.partialorder %v3405_v47, 0.0 }
0x1e82   :  { %v4293_v36 = vpop.eup %4292 }
0x1e83   :  { %v3407_v48 = vmul.f32 %v4293_v36, %v3404_v44 }
0x1e85   :  { %v3409_v53 = vsel %vm3408_vm1, %v3404_v44, %v3407_v48 }
0x1e86   :  { %v4295_v54 = vpop.eup %4294  ;;  %v3412_v56 = vsel %vm3410_vm6, %v3411_v51, %v3409_v53 }
0x1e87   :  { %v3420_v0 = vadd.f32 1e-06, %v3412_v56  ;;  %v3414_v57 = vmul.f32 %v4295_v54, %v3405_v47 }
0x1e89   :  { %4296 = vrcp.f32 %v3420_v0  ;;  %v3416_v45 = vsel %vm3415_vm7, %v3405_v47, %v3414_v57 }
0x1e8a   :  { %v3419_v1 = vsel %vm3417_vm8, %v3418_v58, %v3416_v45  ;;  %v3804_v58 = vld [vmem:[%s4989_s4] ss:$0 sm:$0xff] }
0x1e8b   :  { %v3421_v39 = vadd.f32 1e-06, %v3419_v1 }
0x1e8d   :  { %4298 = vrcp.f32 %v3421_v39  ;;  %v3805_v39 = vld [vmem:[%s4989_s4 + $0x1] ss:$0 sm:$0xff]  ;;  %s4423_s4 = smov 32  }
0x1e93   :  { %v4297_v62 = vpop.eup %4296 }
0x1e94   :  { %v3430_v2 = vmul.f32 %v4297_v62, %v3428_v50 }
0x1e96   :  { %v3436_v6 = vadd.f32 %v3793_v4, %v3430_v2 }
0x1e97   :  { %v4299_v3 = vpop.eup %4298 }
0x1e98   :  { %v3431_v5 = vmul.f32 %v4299_v3, %v3429_v63 }
0x1e9a   :  { %v3437_v49 = vadd.f32 %v3793_v4, %v3431_v5 }
0x1e9c   :  { %v3438_v8 = vpack.c.bf16 %v3437_v49, %v3436_v6 }
0x1e9e   :  { %4116 = vmatmul.mubr.msk.bf16.vlgmr.msra.gmra.mrb[48].mxu0 %vm111_vm0, %v3438_v8 }
0x1f71   :  { %v3492_v11 = vpop.f32.mrb[48].mxu0 }
0x1f72   :  { %v3493_v13 = vadd.f32 %v3794_v10, %v3492_v11  ;;  %v4117_v16 = vpop.f32.mrb[49].mxu0 }
0x1f73   :  { %v3495_v17 = vpop.f32.mrb[50].mxu0 }
0x1f74   :  { %v3496_v46 = vadd.f32 %v3794_v10, %v3495_v17  ;;  %v4118_v18 = vpop.f32.mrb[51].mxu0  ;;  %v3499_v19 = vmax.f32 %v3493_v13, 0.0 }
0x1f76   :  { %v3500_v20 = vmax.f32 %v3496_v46, 0.0 }
0x1f78   :  { %v3501_v14 = vpack.c.bf16 %v3500_v20, %v3499_v19 }
0x1f7a   :  { %4128 = vmatmul.mubr.msk.bf16.vlgmr.msra.gmra.mrb[44].mxu1 %vm1779_vm15, %v3501_v14 }
0x204d   :  { %v3563_v22 = vpop.f32.mrb[44].mxu1 }
0x204e   :  { %v3570_v12 = vadd.f32 %v3563_v22, %v4926_v24  ;;  %v4129_v23 = vpop.f32.mrb[45].mxu1 }
0x204f   :  { %v3566_v15 = vpop.f32.mrb[46].mxu1 }
0x2050   :  { %v3576_v25 = vadd.f32 %v3803_v21, %v3570_v12  ;;  %v3571_v26 = vadd.f32 %v3566_v15, %v4929_v27  ;;  %v4130_v28 = vpop.f32.mrb[47].mxu1 }
0x2052   :  { %v3577_v29 = vadd.f32 %v3803_v21, %v3571_v26  ;;  %v3580_v30 = vsel %vm111_vm0, %v3576_v25, 0.0 }
0x2053   :  { %3581 = vadd.xlane.f32.xlu0 %v3580_v30 }
0x2054   :  { %v3583_v32 = vsel %vm111_vm0, %v3577_v29, 0.0 }
0x2055   :  { %3584 = vadd.xlane.f32.xlu1 %v3583_v32 }
0x20e0   :  { %v3582_v34 = vpop.xlane.xlu0 %3581 }
0x20e1   :  { %v3586_v35 = vmul.f32 0.03125, %v3582_v34 }
0x20e2   :  { %v3585_v52 = vpop.xlane.xlu1 %3584 }
0x20e3   :  { %v3588_v37 = vsub.f32 %v3576_v25, %v3586_v35  ;;  %v3587_v38 = vmul.f32 0.03125, %v3585_v52 }
0x20e5   :  { %v3589_v55 = vsub.f32 %v3577_v29, %v3587_v38  ;;  %v3590_v24 = vmul.f32 %v3588_v37, %v3588_v37  ;;  %v3622_v45 = vmul.f32 %v3804_v58, %v3588_v37 }
0x20e7   :  { %v3592_v40 = vsel %vm111_vm0, %v3590_v24, 0.0  ;;  %v3591_v41 = vmul.f32 %v3589_v55, %v3589_v55  ;;  %v3623_v62 = vmul.f32 %v3804_v58, %v3589_v55 }
0x20e8   :  { %3593 = vadd.xlane.f32.xlu0 %v3592_v40 }
0x20e9   :  { %v3595_v27 = vsel %vm111_vm0, %v3591_v41, 0.0 }
0x20ea   :  { %3596 = vadd.xlane.f32.xlu1 %v3595_v27 }
0x2175   :  { %v3594_v33 = vpop.xlane.xlu0 %3593 }
0x2176   :  { %v3598_v60 = vmul.f32 0.032258064, %v3594_v33 }
0x2177   :  { %v3597_v42 = vpop.xlane.xlu1 %3596 }
0x2178   :  { %4300 = vrsqrt.f32 %v3598_v60  ;;  %v3599_v43 = vmul.f32 0.032258064, %v3597_v42  ;;  %vm3602_vm9 = vcmp.eq.f32.partialorder %v3598_v60, inf  ;;  %v3605_v61 = vand.u32 2147483648, %v3598_v60 }
0x2179   :  { %vm3604_vm10 = vcmp.eq.f32.partialorder %v3598_v60, 0.0 }
0x217a   :  { %4302 = vrsqrt.f32 %v3599_v43  ;;  %vm3609_vm11 = vcmp.eq.f32.partialorder %v3599_v43, inf  ;;  %v3612_v54 = vand.u32 2147483648, %v3599_v43  ;;  %vm3611_vm12 = vcmp.eq.f32.partialorder %v3599_v43, 0.0 }
0x2182   :  { %v4301_v31 = vpop.eup %4300 }
0x2183   :  { %v3601_v44 = vmul.f32 %v4301_v31, %v3598_v60 }
0x2184   :  { %v4303_v47 = vpop.eup %4302 }
0x2185   :  { %v3603_v36 = vsel %vm3602_vm9, %v3598_v60, %v3601_v44  ;;  %v3608_v51 = vmul.f32 %v4303_v47, %v3599_v43 }
0x2186   :  { %v3606_v48 = vsel %vm3604_vm10, %v3605_v61, %v3603_v36 }
0x2187   :  { %v3614_v53 = vadd.f32 1e-06, %v3606_v48  ;;  %v3610_v56 = vsel %vm3609_vm11, %v3599_v43, %v3608_v51 }
0x2188   :  { %v3613_v0 = vsel %vm3611_vm12, %v3612_v54, %v3610_v56 }
0x2189   :  { %4304 = vrcp.f32 %v3614_v53  ;;  %v3615_v57 = vadd.f32 1e-06, %v3613_v0 }
0x218b   :  { %4306 = vrcp.f32 %v3615_v57 }
0x2193   :  { %v4305_v1 = vpop.eup %4304 }
0x2194   :  { %v3624_v59 = vmul.f32 %v4305_v1, %v3622_v45 }
0x2195   :  { %v4307_v50 = vpop.eup %4306 }
0x2196   :  { %v3630_v63 = vadd.f32 %v3805_v39, %v3624_v59  ;;  %v3625_v2 = vmul.f32 %v4307_v50, %v3623_v62 }
0x2198   :  { %v3638_v3 = vrot.slane %v3630_v63, 1  ;;  %v3631_v4 = vadd.f32 %v3805_v39, %v3625_v2  ;;  %v3659_v5 = vrot.slane %v3630_v63, 5  ;;  %v3649_v6 = vrot.slane %v3630_v63, 3 }
0x2199   :  { %v3643_v49 = vrot.slane %v3630_v63, 2  ;;  %v3665_v8 = vrot.slane %v3630_v63, 6  ;;  %v3671_v7 = vrot.slane %v3630_v63, 7  ;;  %v3655_v9 = vrot.slane %v3630_v63, 4 }
0x219a   :  { %v3639_v10 = vsel %vm3635_vm13, %v3631_v4, %v3638_v3  ;;  %v3660_v11 = vrot.slane %v3631_v4, 4  ;;  %v3650_v13 = vrot.slane %v3631_v4, 2  ;;  %v3644_v16 = vrot.slane %v3631_v4, 1 }
0x219b   :  { %3640 = vrot.lane.b32.xlu0 %v3639_v10, %s4423_s4  ;;  %v3666_v17 = vrot.slane %v3631_v4, 5  ;;  %v3672_v46 = vrot.slane %v3631_v4, 6  ;;  %v3634_v18 = vrot.slane %v3631_v4, 7  ;;  %v3656_v19 = vrot.slane %v3631_v4, 3 }
0x219c   :  { %v3661_v20 = vsel %vm3635_vm13, %v3660_v11, %v3659_v5  ;;  %v3651_v14 = vsel %vm3635_vm13, %v3650_v13, %v3649_v6  ;;  %v3645_v21 = vsel %vm3635_vm13, %v3644_v16, %v3643_v49 }
0x219d   :  { %3662 = vrot.lane.b32.xlu1 %v3661_v20, %s4423_s4  ;;  %v3667_v22 = vsel %vm3635_vm13, %v3666_v17, %v3665_v8  ;;  %v3673_v12 = vsel %vm3635_vm13, %v3672_v46, %v3671_v7  ;;  %v3636_v23 = vsel %vm3635_vm13, %v3634_v18, %v3630_v63  ;;  %v3657_v15 = vsel %vm3635_vm13, %v3656_v19, %v3655_v9 }
0x219f   :  { %3652 = vrot.lane.b32.xlu0 %v3651_v14, %s4411_s3 }
0x21a1   :  { %3646 = vrot.lane.b32.xlu1 %v3645_v21, %s4403_s28 }
0x21a5   :  { %3668 = vrot.lane.b32.xlu1 %v3667_v22, %s4403_s28  ;;  %s4374_s28 = scalar_lea.vmem %s3703_s25, 64 }
0x21a6   :  { %p4375_p10 = scmp.ne.s32.totalorder %s3703_s25, %s4374_s28  ;;  %p4380_p12 = scmp.lt.s32.totalorder %s4374_s28, %s4374_s28 }
0x21a8   :  { %p4381_p13 = por %p4380_p12, %p4379_p11 }
0x21a9   :  { %3674 = vrot.lane.b32.xlu1 %v3673_v12, %s4411_s3 }
0x21aa   :  { %p4382_p0 = pnand %p4381_p13, %p4375_p10 }
0x220d   :  { %v3641_v28 = vpop.permute.xlu0 %3640 }
0x220e   :  { %v3677_v30 = vsel %vm111_vm0, %v3636_v23, %v3641_v28 }
0x220f   :  { %v3663_v25 = vpop.permute.xlu1 %3662 }
0x2210   :  { %v3681_v34 = vsel %vm111_vm0, %v3657_v15, %v3663_v25 }
0x2211   :  { %v3653_v35 = vpop.permute.xlu0 %3652 }
0x2213   :  { %v3647_v26 = vpop.permute.xlu1 %3646 }
0x2214   :  { %v3678_v32 = vsel %vm1779_vm15, %v3677_v30, %v3647_v26 }
0x2215   :  { %v3680_v38 = vsel %vm3679_vm14, %v3678_v32, %v3653_v35 }
0x2217   :  { %v3669_v29 = vpop.permute.xlu1 %3668 }
0x2218   :  { %v3682_v52 = vsel %vm1779_vm15, %v3681_v34, %v3669_v29 }
0x221b   :  { %v3675_v37 = vpop.permute.xlu1 %3674 }
0x221c   :  { %v3683_v55 = vsel %vm3679_vm14, %v3682_v52, %v3675_v37 }
0x221d   :  { %v3686_v24 = vcombine.low %v3680_v38, %v3683_v55 }
0x221f   :  { %3806 = vst.sshfl [vmem:[#allocation8] sm:$0x33 pattern:$0x76325410] %v3686_v24 }
0x2220   :  { %4385 = shalt.err (!%p4382_p0)
}
0x2221   :  { %s4386_s29 = scalar_lea.hbm %s4990_s5, 64 }
0x2222   :  { %p4387_p1 = scmp.ne.s32.totalorder %s4990_s5, %s4386_s29  ;;  %p4390_p2 = scmp.lt.u32.totalorder %s4386_s29, %s4990_s5 }
0x2224   :  { %p4392_p3 = pnand %p4390_p2, %p4387_p1 }
0x2226   :  { %4395 = shalt.err (!%p4392_p3)
}
0x2227   :  { %3705 = dma.vmem_to_hbm [thread:$0]  %s3703_s25, 64, %s4990_s5, [#allocation4]  }
0x2228   :  { %4400 = dma.done.wait [#allocation4], 64  }
0x2229   :  { %4401 = vsyncadd [#allocation4], 4294967232 }
0x222a   :  { %3709 = vsyncpa [#allocation3], 1 }
0x222b   :  { %3710 = vsyncpa [#allocation6], 1 }
0x222c   :  { %3711 = vsyncpa [#allocation4], 1 }

</bundles_post_ra>
